<compile_context>
chip_gen: v7x
topology: tpu7x:2x2x1
jax: 0.10.0
libtpu: 0.0.40
codegen_flags: <defaults>
</compile_context>

<pallas_src>
import jax
import jax.numpy as jnp
from jax.experimental import pallas as pl
from jax.experimental.pallas import tpu as pltpu


def generator_kernel(featrand_ref, wf_ref, bf_ref,
                     cap_ref, wih_ref, blstm_ref, whh_ref,
                     wout_ref, bout_ref,
                     out_ref,
                     hid_sc):
    H = whh_ref.shape[0]
    S = cap_ref.shape[0]

    # ---- init_hidden (batch row 0 only): h0 = ReLU((features ++ noise) @ Wf + bf), c0 = 0
    h0 = jnp.dot(featrand_ref[...], wf_ref[...], preferred_element_type=jnp.float32)
    h = jnp.maximum(h0 + bf_ref[...], 0.0)                 # (1, H) f32, vreg-resident
    c = jnp.zeros((1, H), jnp.float32)                     # (1, H) f32, vreg-resident

    # ---- hoisted input projection + fused bias: one (S, E) x (E, 4H) matmul.
    # (g-gate columns of W_ih / W_hh / bias were pre-scaled by 2 in the wrapper.)
    gx = (jnp.dot(cap_ref[...], wih_ref[...], preferred_element_type=jnp.float32)
          + blstm_ref[...])                                # (S, 4H) f32 value (~4 vregs)

    # ---- LSTM recurrence, fully unrolled (S is small & static), gate order i, f, g, o.
    # State (h, c) and gx stay in vregs; only hidden rows hit VMEM (for the epilogue),
    # and that store is off the serial dependence chain.
    for t in range(S):
        gates = gx[t:t + 1, :] + jnp.dot(h.astype(jnp.bfloat16), whh_ref[...],
                                         preferred_element_type=jnp.float32)  # (1, 4H)
        a = jax.nn.sigmoid(gates)                 # one EUP stream over all 4 gate blocks
        i_g = a[:, 0:H]
        f_g = a[:, H:2 * H]
        g_g = 2.0 * a[:, 2 * H:3 * H] - 1.0       # == tanh of the original g pre-activation
        o_g = a[:, 3 * H:4 * H]
        c = f_g * c + i_g * g_g
        h = o_g * jnp.tanh(c)
        hid_sc[t:t + 1, :] = h                    # masked sublane store, off critical path

    # ---- output_linear on the batch-0 hidden sequence: (S, H) @ (H, V) + b ----
    out_ref[...] = (jnp.dot(hid_sc[...].astype(jnp.bfloat16), wout_ref[...],
                            preferred_element_type=jnp.float32) + bout_ref[...])


def conditional_generator_forward(features, noise, captions, params):
    B, S, E = captions.shape
    H = params["w_hh"].shape[0]
    V = params["w_out"].shape[1]

    # forward() only consumes hiddens[0] (batch_first=True => batch element 0's hidden
    # sequence) and LSTM batch rows are independent, so rows 1..B-1 never affect the
    # output.  This wrapper intentionally restricts everything to row 0; a full-batch
    # caller must NOT reuse it as-is.
    featrand0 = jnp.concatenate([features[0:1], noise[0:1]], axis=1)   # (1, F+N)
    cap0 = captions[0]                                                 # (S, E)

    # --- one-time parameter prep (would live at model-load time in production) ---
    # Fuse b_ih + b_hh, pre-scale the g-gate columns by 2 (tanh(x) = 2*sigmoid(2x)-1),
    # and cast all MXU operands to bf16 (accumulation stays f32 inside the kernel).
    gate_scale = jnp.concatenate(
        [jnp.ones((1, 2 * H), jnp.float32),
         jnp.full((1, H), 2.0, jnp.float32),
         jnp.ones((1, H), jnp.float32)], axis=1)                       # (1, 4H)
    w_ih = (params["w_ih"] * gate_scale).astype(jnp.bfloat16)          # (E, 4H)
    w_hh = (params["w_hh"] * gate_scale).astype(jnp.bfloat16)          # (H, 4H)
    b_lstm = (params["b_ih"] + params["b_hh"]) * gate_scale            # (1, 4H) f32
    w_f = params["w_f"].astype(jnp.bfloat16)                           # (F+N, H)
    w_out = params["w_out"].astype(jnp.bfloat16)                       # (H, V)

    vmem = pl.BlockSpec(memory_space=pltpu.MemorySpace.VMEM)
    out = pl.pallas_call(
        generator_kernel,
        out_shape=jax.ShapeDtypeStruct((S, V), jnp.float32),
        in_specs=[vmem] * 9,
        out_specs=vmem,
        scratch_shapes=[
            pltpu.VMEM((S, H), jnp.float32),   # hidden sequence for the epilogue matmul
        ],
    )(featrand0.astype(jnp.bfloat16), w_f, params["b_f"],
      cap0.astype(jnp.bfloat16), w_ih, b_lstm, w_hh,
      w_out, params["b_out"])
    return out


def reference_forward(features, noise, captions, params):
    """Pure-JAX f32 reference of the same forward pass (full batch, then hiddens[0])."""
    B, S, E = captions.shape
    H = params["w_hh"].shape[0]
    featrand = jnp.concatenate([features, noise], axis=1)
    h = jax.nn.relu(featrand @ params["w_f"] + params["b_f"])
    c = jnp.zeros((B, H), jnp.float32)
    hids = []
    for t in range(S):
        x = captions[:, t, :]
        g = x @ params["w_ih"] + params["b_ih"] + h @ params["w_hh"] + params["b_hh"]
        i_g = jax.nn.sigmoid(g[:, 0:H])
        f_g = jax.nn.sigmoid(g[:, H:2 * H])
        g_g = jnp.tanh(g[:, 2 * H:3 * H])
        o_g = jax.nn.sigmoid(g[:, 3 * H:4 * H])
        c = f_g * c + i_g * g_g
        h = o_g * jnp.tanh(c)
        hids.append(h[0])
    hid = jnp.stack(hids, axis=0)                      # (S, H) -- batch element 0
    return hid @ params["w_out"] + params["b_out"]


if __name__ == "__main__":
    # Small shapes consistent with the module (scaled down):
    B = 2          # batch
    F = 256        # cnn_output_size
    N = 128        # len(mean)  (noise dim)
    H = 128        # input_encoding_size (LSTM hidden)
    E = 32         # corpus.embed_size
    V = 256        # corpus.vocab_size
    S = 8          # caption length

    key = jax.random.PRNGKey(0)
    ks = jax.random.split(key, 12)
    scale = 0.05

    params = {
        # features_linear: Linear(F+N, H) stored as (in, out)
        "w_f":   scale * jax.random.normal(ks[0], (F + N, H), jnp.float32),
        "b_f":   scale * jax.random.normal(ks[1], (1, H), jnp.float32),
        # LSTM (PyTorch: weight_ih (4H,E), weight_hh (4H,H)) stored transposed
        "w_ih":  scale * jax.random.normal(ks[2], (E, 4 * H), jnp.float32),
        "b_ih":  scale * jax.random.normal(ks[3], (1, 4 * H), jnp.float32),
        "w_hh":  scale * jax.random.normal(ks[4], (H, 4 * H), jnp.float32),
        "b_hh":  scale * jax.random.normal(ks[5], (1, 4 * H), jnp.float32),
        # output_linear: Linear(H, V) stored as (in, out)
        "w_out": scale * jax.random.normal(ks[6], (H, V), jnp.float32),
        "b_out": scale * jax.random.normal(ks[7], (1, V), jnp.float32),
    }

    features = jax.random.normal(ks[8], (B, F), jnp.float32)
    captions = jax.random.normal(ks[9], (B, S, E), jnp.float32)
    # dist.sample in the PyTorch code is stochastic; here the N(0,1) noise is
    # drawn deterministically from the PRNG key and passed in explicitly.
    noise = jax.random.normal(ks[10], (B, N), jnp.float32)

    out = conditional_generator_forward(features, noise, captions, params)
    out = jax.block_until_ready(out)
    assert out.shape == (S, V), out.shape

    ref = reference_forward(features, noise, captions, params)
    # Tolerance is loosened vs. the f32 reference because MXU operands are bf16
    # (gate/elementwise math is still f32); observed error is a few 1e-3.
    err = float(jnp.max(jnp.abs(out - ref)))
    assert jnp.allclose(out, ref, atol=2e-2, rtol=2e-2), err

    print("KERNEL_OK")
</pallas_src>

<mosaic_0001>
module attributes {stable_mosaic.version = 11 : i64} {
  func.func @generator_kernel(%arg0: memref<1x384xbf16, #tpu.memory_space<vmem>>, %arg1: memref<384x128xbf16, #tpu.memory_space<vmem>>, %arg2: memref<1x128xf32, #tpu.memory_space<vmem>>, %arg3: memref<8x32xbf16, #tpu.memory_space<vmem>>, %arg4: memref<32x512xbf16, #tpu.memory_space<vmem>>, %arg5: memref<1x512xf32, #tpu.memory_space<vmem>>, %arg6: memref<128x512xbf16, #tpu.memory_space<vmem>>, %arg7: memref<128x256xbf16, #tpu.memory_space<vmem>>, %arg8: memref<1x256xf32, #tpu.memory_space<vmem>>, %arg9: memref<8x256xf32, #tpu.memory_space<vmem>>, %arg10: memref<8x128xf32, #tpu.memory_space<vmem>>) attributes {dimension_semantics = [], scalar_prefetch = 0 : i64, scratch_operands = 1 : i64, tpu.core_type = #tpu.core_type<tc>} {
    %c0 = arith.constant 0 : index
    %c0_0 = arith.constant 0 : index
    %0 = vector.load %arg0[%c0, %c0_0] : memref<1x384xbf16, #tpu.memory_space<vmem>>, vector<1x384xbf16>
    %c0_1 = arith.constant 0 : index
    %c0_2 = arith.constant 0 : index
    %1 = vector.load %arg1[%c0_1, %c0_2] : memref<384x128xbf16, #tpu.memory_space<vmem>>, vector<384x128xbf16>
    %cst = arith.constant dense<0.000000e+00> : vector<1x128xf32>
    %2 = tpu.matmul %0, %1, %cst {dimension_numbers = #tpu.dot_dimension_numbers<[1], [0], [0], [1], [0, 0, 1, 1], [], []>} : vector<1x384xbf16>, vector<384x128xbf16>, vector<1x128xf32> -> vector<1x128xf32>
    %c0_3 = arith.constant 0 : index
    %c0_4 = arith.constant 0 : index
    %3 = vector.load %arg2[%c0_3, %c0_4] : memref<1x128xf32, #tpu.memory_space<vmem>>, vector<1x128xf32>
    %4 = arith.addf %2, %3 : vector<1x128xf32>
    %cst_5 = arith.constant 0.000000e+00 : f32
    %5 = vector.broadcast %cst_5 : f32 to vector<1x128xf32>
    %6 = arith.maximumf %4, %5 : vector<1x128xf32>
    %cst_6 = arith.constant 0.000000e+00 : f32
    %7 = vector.broadcast %cst_6 : f32 to vector<1x128xf32>
    %c0_7 = arith.constant 0 : index
    %c0_8 = arith.constant 0 : index
    %8 = vector.load %arg3[%c0_7, %c0_8] : memref<8x32xbf16, #tpu.memory_space<vmem>>, vector<8x32xbf16>
    %c0_9 = arith.constant 0 : index
    %c0_10 = arith.constant 0 : index
    %9 = vector.load %arg4[%c0_9, %c0_10] : memref<32x512xbf16, #tpu.memory_space<vmem>>, vector<32x512xbf16>
    %cst_11 = arith.constant dense<0.000000e+00> : vector<8x512xf32>
    %10 = tpu.matmul %8, %9, %cst_11 {dimension_numbers = #tpu.dot_dimension_numbers<[1], [0], [0], [1], [0, 0, 1, 1], [], []>} : vector<8x32xbf16>, vector<32x512xbf16>, vector<8x512xf32> -> vector<8x512xf32>
    %c0_12 = arith.constant 0 : index
    %c0_13 = arith.constant 0 : index
    %11 = vector.load %arg5[%c0_12, %c0_13] : memref<1x512xf32, #tpu.memory_space<vmem>>, vector<1x512xf32>
    %12 = vector.broadcast %11 : vector<1x512xf32> to vector<8x512xf32>
    %13 = arith.addf %10, %12 : vector<8x512xf32>
    %14 = vector.extract_strided_slice %13 {offsets = [0, 0], sizes = [1, 512], strides = [1, 1]} : vector<8x512xf32> to vector<1x512xf32>
    %15 = arith.truncf %6 : vector<1x128xf32> to vector<1x128xbf16>
    %c0_14 = arith.constant 0 : index
    %c0_15 = arith.constant 0 : index
    %16 = vector.load %arg6[%c0_14, %c0_15] : memref<128x512xbf16, #tpu.memory_space<vmem>>, vector<128x512xbf16>
    %cst_16 = arith.constant dense<0.000000e+00> : vector<1x512xf32>
    %17 = tpu.matmul %15, %16, %cst_16 {dimension_numbers = #tpu.dot_dimension_numbers<[1], [0], [0], [1], [0, 0, 1, 1], [], []>} : vector<1x128xbf16>, vector<128x512xbf16>, vector<1x512xf32> -> vector<1x512xf32>
    %18 = arith.addf %14, %17 : vector<1x512xf32>
    %19 = arith.negf %18 : vector<1x512xf32>
    %20 = math.exp %19 : vector<1x512xf32>
    %cst_17 = arith.constant 1.000000e+00 : f32
    %21 = vector.broadcast %cst_17 : f32 to vector<1x512xf32>
    %22 = arith.addf %21, %20 : vector<1x512xf32>
    %23 = arith.divf %21, %22 : vector<1x512xf32>
    %24 = vector.extract_strided_slice %23 {offsets = [0, 0], sizes = [1, 128], strides = [1, 1]} : vector<1x512xf32> to vector<1x128xf32>
    %25 = vector.extract_strided_slice %23 {offsets = [0, 128], sizes = [1, 128], strides = [1, 1]} : vector<1x512xf32> to vector<1x128xf32>
    %26 = vector.extract_strided_slice %23 {offsets = [0, 256], sizes = [1, 128], strides = [1, 1]} : vector<1x512xf32> to vector<1x128xf32>
    %cst_18 = arith.constant 2.000000e+00 : f32
    %27 = vector.broadcast %cst_18 : f32 to vector<1x128xf32>
    %28 = arith.mulf %27, %26 : vector<1x128xf32>
    %cst_19 = arith.constant 1.000000e+00 : f32
    %29 = vector.broadcast %cst_19 : f32 to vector<1x128xf32>
    %30 = arith.subf %28, %29 : vector<1x128xf32>
    %31 = vector.extract_strided_slice %23 {offsets = [0, 384], sizes = [1, 128], strides = [1, 1]} : vector<1x512xf32> to vector<1x128xf32>
    %32 = arith.mulf %25, %7 : vector<1x128xf32>
    %33 = arith.mulf %24, %30 : vector<1x128xf32>
    %34 = arith.addf %32, %33 : vector<1x128xf32>
    %35 = math.tanh %34 : vector<1x128xf32>
    %36 = arith.mulf %31, %35 : vector<1x128xf32>
    %c0_20 = arith.constant 0 : index
    %c0_21 = arith.constant 0 : index
    %37 = vector.load %arg10[%c0_20, %c0_21] : memref<8x128xf32, #tpu.memory_space<vmem>>, vector<1x128xf32>
    tpu.vector_store %arg10[%c0_20, %c0_21], %36 {strides = array<i32>} : memref<8x128xf32, #tpu.memory_space<vmem>>, vector<1x128xf32>,
    %38 = vector.extract_strided_slice %13 {offsets = [1, 0], sizes = [1, 512], strides = [1, 1]} : vector<8x512xf32> to vector<1x512xf32>
    %39 = arith.truncf %36 : vector<1x128xf32> to vector<1x128xbf16>
    %c0_22 = arith.constant 0 : index
    %c0_23 = arith.constant 0 : index
    %40 = vector.load %arg6[%c0_22, %c0_23] : memref<128x512xbf16, #tpu.memory_space<vmem>>, vector<128x512xbf16>
    %cst_24 = arith.constant dense<0.000000e+00> : vector<1x512xf32>
    %41 = tpu.matmul %39, %40, %cst_24 {dimension_numbers = #tpu.dot_dimension_numbers<[1], [0], [0], [1], [0, 0, 1, 1], [], []>} : vector<1x128xbf16>, vector<128x512xbf16>, vector<1x512xf32> -> vector<1x512xf32>
    %42 = arith.addf %38, %41 : vector<1x512xf32>
    %43 = arith.negf %42 : vector<1x512xf32>
    %44 = math.exp %43 : vector<1x512xf32>
    %cst_25 = arith.constant 1.000000e+00 : f32
    %45 = vector.broadcast %cst_25 : f32 to vector<1x512xf32>
    %46 = arith.addf %45, %44 : vector<1x512xf32>
    %47 = arith.divf %45, %46 : vector<1x512xf32>
    %48 = vector.extract_strided_slice %47 {offsets = [0, 0], sizes = [1, 128], strides = [1, 1]} : vector<1x512xf32> to vector<1x128xf32>
    %49 = vector.extract_strided_slice %47 {offsets = [0, 128], sizes = [1, 128], strides = [1, 1]} : vector<1x512xf32> to vector<1x128xf32>
    %50 = vector.extract_strided_slice %47 {offsets = [0, 256], sizes = [1, 128], strides = [1, 1]} : vector<1x512xf32> to vector<1x128xf32>
    %cst_26 = arith.constant 2.000000e+00 : f32
    %51 = vector.broadcast %cst_26 : f32 to vector<1x128xf32>
    %52 = arith.mulf %51, %50 : vector<1x128xf32>
    %cst_27 = arith.constant 1.000000e+00 : f32
    %53 = vector.broadcast %cst_27 : f32 to vector<1x128xf32>
    %54 = arith.subf %52, %53 : vector<1x128xf32>
    %55 = vector.extract_strided_slice %47 {offsets = [0, 384], sizes = [1, 128], strides = [1, 1]} : vector<1x512xf32> to vector<1x128xf32>
    %56 = arith.mulf %49, %34 : vector<1x128xf32>
    %57 = arith.mulf %48, %54 : vector<1x128xf32>
    %58 = arith.addf %56, %57 : vector<1x128xf32>
    %59 = math.tanh %58 : vector<1x128xf32>
    %60 = arith.mulf %55, %59 : vector<1x128xf32>
    %c1 = arith.constant 1 : index
    %c0_28 = arith.constant 0 : index
    %61 = vector.load %arg10[%c1, %c0_28] : memref<8x128xf32, #tpu.memory_space<vmem>>, vector<1x128xf32>
    tpu.vector_store %arg10[%c1, %c0_28], %60 {strides = array<i32>} : memref<8x128xf32, #tpu.memory_space<vmem>>, vector<1x128xf32>,
    %62 = vector.extract_strided_slice %13 {offsets = [2, 0], sizes = [1, 512], strides = [1, 1]} : vector<8x512xf32> to vector<1x512xf32>
    %63 = arith.truncf %60 : vector<1x128xf32> to vector<1x128xbf16>
    %c0_29 = arith.constant 0 : index
    %c0_30 = arith.constant 0 : index
    %64 = vector.load %arg6[%c0_29, %c0_30] : memref<128x512xbf16, #tpu.memory_space<vmem>>, vector<128x512xbf16>
    %cst_31 = arith.constant dense<0.000000e+00> : vector<1x512xf32>
    %65 = tpu.matmul %63, %64, %cst_31 {dimension_numbers = #tpu.dot_dimension_numbers<[1], [0], [0], [1], [0, 0, 1, 1], [], []>} : vector<1x128xbf16>, vector<128x512xbf16>, vector<1x512xf32> -> vector<1x512xf32>
    %66 = arith.addf %62, %65 : vector<1x512xf32>
    %67 = arith.negf %66 : vector<1x512xf32>
    %68 = math.exp %67 : vector<1x512xf32>
    %cst_32 = arith.constant 1.000000e+00 : f32
    %69 = vector.broadcast %cst_32 : f32 to vector<1x512xf32>
    %70 = arith.addf %69, %68 : vector<1x512xf32>
    %71 = arith.divf %69, %70 : vector<1x512xf32>
    %72 = vector.extract_strided_slice %71 {offsets = [0, 0], sizes = [1, 128], strides = [1, 1]} : vector<1x512xf32> to vector<1x128xf32>
    %73 = vector.extract_strided_slice %71 {offsets = [0, 128], sizes = [1, 128], strides = [1, 1]} : vector<1x512xf32> to vector<1x128xf32>
    %74 = vector.extract_strided_slice %71 {offsets = [0, 256], sizes = [1, 128], strides = [1, 1]} : vector<1x512xf32> to vector<1x128xf32>
    %cst_33 = arith.constant 2.000000e+00 : f32
    %75 = vector.broadcast %cst_33 : f32 to vector<1x128xf32>
    %76 = arith.mulf %75, %74 : vector<1x128xf32>
    %cst_34 = arith.constant 1.000000e+00 : f32
    %77 = vector.broadcast %cst_34 : f32 to vector<1x128xf32>
    %78 = arith.subf %76, %77 : vector<1x128xf32>
    %79 = vector.extract_strided_slice %71 {offsets = [0, 384], sizes = [1, 128], strides = [1, 1]} : vector<1x512xf32> to vector<1x128xf32>
    %80 = arith.mulf %73, %58 : vector<1x128xf32>
    %81 = arith.mulf %72, %78 : vector<1x128xf32>
    %82 = arith.addf %80, %81 : vector<1x128xf32>
    %83 = math.tanh %82 : vector<1x128xf32>
    %84 = arith.mulf %79, %83 : vector<1x128xf32>
    %c2 = arith.constant 2 : index
    %c0_35 = arith.constant 0 : index
    %85 = vector.load %arg10[%c2, %c0_35] : memref<8x128xf32, #tpu.memory_space<vmem>>, vector<1x128xf32>
    tpu.vector_store %arg10[%c2, %c0_35], %84 {strides = array<i32>} : memref<8x128xf32, #tpu.memory_space<vmem>>, vector<1x128xf32>,
    %86 = vector.extract_strided_slice %13 {offsets = [3, 0], sizes = [1, 512], strides = [1, 1]} : vector<8x512xf32> to vector<1x512xf32>
    %87 = arith.truncf %84 : vector<1x128xf32> to vector<1x128xbf16>
    %c0_36 = arith.constant 0 : index
    %c0_37 = arith.constant 0 : index
    %88 = vector.load %arg6[%c0_36, %c0_37] : memref<128x512xbf16, #tpu.memory_space<vmem>>, vector<128x512xbf16>
    %cst_38 = arith.constant dense<0.000000e+00> : vector<1x512xf32>
    %89 = tpu.matmul %87, %88, %cst_38 {dimension_numbers = #tpu.dot_dimension_numbers<[1], [0], [0], [1], [0, 0, 1, 1], [], []>} : vector<1x128xbf16>, vector<128x512xbf16>, vector<1x512xf32> -> vector<1x512xf32>
    %90 = arith.addf %86, %89 : vector<1x512xf32>
    %91 = arith.negf %90 : vector<1x512xf32>
    %92 = math.exp %91 : vector<1x512xf32>
    %cst_39 = arith.constant 1.000000e+00 : f32
    %93 = vector.broadcast %cst_39 : f32 to vector<1x512xf32>
    %94 = arith.addf %93, %92 : vector<1x512xf32>
    %95 = arith.divf %93, %94 : vector<1x512xf32>
    %96 = vector.extract_strided_slice %95 {offsets = [0, 0], sizes = [1, 128], strides = [1, 1]} : vector<1x512xf32> to vector<1x128xf32>
    %97 = vector.extract_strided_slice %95 {offsets = [0, 128], sizes = [1, 128], strides = [1, 1]} : vector<1x512xf32> to vector<1x128xf32>
    %98 = vector.extract_strided_slice %95 {offsets = [0, 256], sizes = [1, 128], strides = [1, 1]} : vector<1x512xf32> to vector<1x128xf32>
    %cst_40 = arith.constant 2.000000e+00 : f32
    %99 = vector.broadcast %cst_40 : f32 to vector<1x128xf32>
    %100 = arith.mulf %99, %98 : vector<1x128xf32>
    %cst_41 = arith.constant 1.000000e+00 : f32
    %101 = vector.broadcast %cst_41 : f32 to vector<1x128xf32>
    %102 = arith.subf %100, %101 : vector<1x128xf32>
    %103 = vector.extract_strided_slice %95 {offsets = [0, 384], sizes = [1, 128], strides = [1, 1]} : vector<1x512xf32> to vector<1x128xf32>
    %104 = arith.mulf %97, %82 : vector<1x128xf32>
    %105 = arith.mulf %96, %102 : vector<1x128xf32>
    %106 = arith.addf %104, %105 : vector<1x128xf32>
    %107 = math.tanh %106 : vector<1x128xf32>
    %108 = arith.mulf %103, %107 : vector<1x128xf32>
    %c3 = arith.constant 3 : index
    %c0_42 = arith.constant 0 : index
    %109 = vector.load %arg10[%c3, %c0_42] : memref<8x128xf32, #tpu.memory_space<vmem>>, vector<1x128xf32>
    tpu.vector_store %arg10[%c3, %c0_42], %108 {strides = array<i32>} : memref<8x128xf32, #tpu.memory_space<vmem>>, vector<1x128xf32>,
    %110 = vector.extract_strided_slice %13 {offsets = [4, 0], sizes = [1, 512], strides = [1, 1]} : vector<8x512xf32> to vector<1x512xf32>
    %111 = arith.truncf %108 : vector<1x128xf32> to vector<1x128xbf16>
    %c0_43 = arith.constant 0 : index
    %c0_44 = arith.constant 0 : index
    %112 = vector.load %arg6[%c0_43, %c0_44] : memref<128x512xbf16, #tpu.memory_space<vmem>>, vector<128x512xbf16>
    %cst_45 = arith.constant dense<0.000000e+00> : vector<1x512xf32>
    %113 = tpu.matmul %111, %112, %cst_45 {dimension_numbers = #tpu.dot_dimension_numbers<[1], [0], [0], [1], [0, 0, 1, 1], [], []>} : vector<1x128xbf16>, vector<128x512xbf16>, vector<1x512xf32> -> vector<1x512xf32>
    %114 = arith.addf %110, %113 : vector<1x512xf32>
    %115 = arith.negf %114 : vector<1x512xf32>
    %116 = math.exp %115 : vector<1x512xf32>
    %cst_46 = arith.constant 1.000000e+00 : f32
    %117 = vector.broadcast %cst_46 : f32 to vector<1x512xf32>
    %118 = arith.addf %117, %116 : vector<1x512xf32>
    %119 = arith.divf %117, %118 : vector<1x512xf32>
    %120 = vector.extract_strided_slice %119 {offsets = [0, 0], sizes = [1, 128], strides = [1, 1]} : vector<1x512xf32> to vector<1x128xf32>
    %121 = vector.extract_strided_slice %119 {offsets = [0, 128], sizes = [1, 128], strides = [1, 1]} : vector<1x512xf32> to vector<1x128xf32>
    %122 = vector.extract_strided_slice %119 {offsets = [0, 256], sizes = [1, 128], strides = [1, 1]} : vector<1x512xf32> to vector<1x128xf32>
    %cst_47 = arith.constant 2.000000e+00 : f32
    %123 = vector.broadcast %cst_47 : f32 to vector<1x128xf32>
    %124 = arith.mulf %123, %122 : vector<1x128xf32>
    %cst_48 = arith.constant 1.000000e+00 : f32
    %125 = vector.broadcast %cst_48 : f32 to vector<1x128xf32>
    %126 = arith.subf %124, %125 : vector<1x128xf32>
    %127 = vector.extract_strided_slice %119 {offsets = [0, 384], sizes = [1, 128], strides = [1, 1]} : vector<1x512xf32> to vector<1x128xf32>
    %128 = arith.mulf %121, %106 : vector<1x128xf32>
    %129 = arith.mulf %120, %126 : vector<1x128xf32>
    %130 = arith.addf %128, %129 : vector<1x128xf32>
    %131 = math.tanh %130 : vector<1x128xf32>
    %132 = arith.mulf %127, %131 : vector<1x128xf32>
    %c4 = arith.constant 4 : index
    %c0_49 = arith.constant 0 : index
    %133 = vector.load %arg10[%c4, %c0_49] : memref<8x128xf32, #tpu.memory_space<vmem>>, vector<1x128xf32>
    tpu.vector_store %arg10[%c4, %c0_49], %132 {strides = array<i32>} : memref<8x128xf32, #tpu.memory_space<vmem>>, vector<1x128xf32>,
    %134 = vector.extract_strided_slice %13 {offsets = [5, 0], sizes = [1, 512], strides = [1, 1]} : vector<8x512xf32> to vector<1x512xf32>
    %135 = arith.truncf %132 : vector<1x128xf32> to vector<1x128xbf16>
    %c0_50 = arith.constant 0 : index
    %c0_51 = arith.constant 0 : index
    %136 = vector.load %arg6[%c0_50, %c0_51] : memref<128x512xbf16, #tpu.memory_space<vmem>>, vector<128x512xbf16>
    %cst_52 = arith.constant dense<0.000000e+00> : vector<1x512xf32>
    %137 = tpu.matmul %135, %136, %cst_52 {dimension_numbers = #tpu.dot_dimension_numbers<[1], [0], [0], [1], [0, 0, 1, 1], [], []>} : vector<1x128xbf16>, vector<128x512xbf16>, vector<1x512xf32> -> vector<1x512xf32>
    %138 = arith.addf %134, %137 : vector<1x512xf32>
    %139 = arith.negf %138 : vector<1x512xf32>
    %140 = math.exp %139 : vector<1x512xf32>
    %cst_53 = arith.constant 1.000000e+00 : f32
    %141 = vector.broadcast %cst_53 : f32 to vector<1x512xf32>
    %142 = arith.addf %141, %140 : vector<1x512xf32>
    %143 = arith.divf %141, %142 : vector<1x512xf32>
    %144 = vector.extract_strided_slice %143 {offsets = [0, 0], sizes = [1, 128], strides = [1, 1]} : vector<1x512xf32> to vector<1x128xf32>
    %145 = vector.extract_strided_slice %143 {offsets = [0, 128], sizes = [1, 128], strides = [1, 1]} : vector<1x512xf32> to vector<1x128xf32>
    %146 = vector.extract_strided_slice %143 {offsets = [0, 256], sizes = [1, 128], strides = [1, 1]} : vector<1x512xf32> to vector<1x128xf32>
    %cst_54 = arith.constant 2.000000e+00 : f32
    %147 = vector.broadcast %cst_54 : f32 to vector<1x128xf32>
    %148 = arith.mulf %147, %146 : vector<1x128xf32>
    %cst_55 = arith.constant 1.000000e+00 : f32
    %149 = vector.broadcast %cst_55 : f32 to vector<1x128xf32>
    %150 = arith.subf %148, %149 : vector<1x128xf32>
    %151 = vector.extract_strided_slice %143 {offsets = [0, 384], sizes = [1, 128], strides = [1, 1]} : vector<1x512xf32> to vector<1x128xf32>
    %152 = arith.mulf %145, %130 : vector<1x128xf32>
    %153 = arith.mulf %144, %150 : vector<1x128xf32>
    %154 = arith.addf %152, %153 : vector<1x128xf32>
    %155 = math.tanh %154 : vector<1x128xf32>
    %156 = arith.mulf %151, %155 : vector<1x128xf32>
    %c5 = arith.constant 5 : index
    %c0_56 = arith.constant 0 : index
    %157 = vector.load %arg10[%c5, %c0_56] : memref<8x128xf32, #tpu.memory_space<vmem>>, vector<1x128xf32>
    tpu.vector_store %arg10[%c5, %c0_56], %156 {strides = array<i32>} : memref<8x128xf32, #tpu.memory_space<vmem>>, vector<1x128xf32>,
    %158 = vector.extract_strided_slice %13 {offsets = [6, 0], sizes = [1, 512], strides = [1, 1]} : vector<8x512xf32> to vector<1x512xf32>
    %159 = arith.truncf %156 : vector<1x128xf32> to vector<1x128xbf16>
    %c0_57 = arith.constant 0 : index
    %c0_58 = arith.constant 0 : index
    %160 = vector.load %arg6[%c0_57, %c0_58] : memref<128x512xbf16, #tpu.memory_space<vmem>>, vector<128x512xbf16>
    %cst_59 = arith.constant dense<0.000000e+00> : vector<1x512xf32>
    %161 = tpu.matmul %159, %160, %cst_59 {dimension_numbers = #tpu.dot_dimension_numbers<[1], [0], [0], [1], [0, 0, 1, 1], [], []>} : vector<1x128xbf16>, vector<128x512xbf16>, vector<1x512xf32> -> vector<1x512xf32>
    %162 = arith.addf %158, %161 : vector<1x512xf32>
    %163 = arith.negf %162 : vector<1x512xf32>
    %164 = math.exp %163 : vector<1x512xf32>
    %cst_60 = arith.constant 1.000000e+00 : f32
    %165 = vector.broadcast %cst_60 : f32 to vector<1x512xf32>
    %166 = arith.addf %165, %164 : vector<1x512xf32>
    %167 = arith.divf %165, %166 : vector<1x512xf32>
    %168 = vector.extract_strided_slice %167 {offsets = [0, 0], sizes = [1, 128], strides = [1, 1]} : vector<1x512xf32> to vector<1x128xf32>
    %169 = vector.extract_strided_slice %167 {offsets = [0, 128], sizes = [1, 128], strides = [1, 1]} : vector<1x512xf32> to vector<1x128xf32>
    %170 = vector.extract_strided_slice %167 {offsets = [0, 256], sizes = [1, 128], strides = [1, 1]} : vector<1x512xf32> to vector<1x128xf32>
    %cst_61 = arith.constant 2.000000e+00 : f32
    %171 = vector.broadcast %cst_61 : f32 to vector<1x128xf32>
    %172 = arith.mulf %171, %170 : vector<1x128xf32>
    %cst_62 = arith.constant 1.000000e+00 : f32
    %173 = vector.broadcast %cst_62 : f32 to vector<1x128xf32>
    %174 = arith.subf %172, %173 : vector<1x128xf32>
    %175 = vector.extract_strided_slice %167 {offsets = [0, 384], sizes = [1, 128], strides = [1, 1]} : vector<1x512xf32> to vector<1x128xf32>
    %176 = arith.mulf %169, %154 : vector<1x128xf32>
    %177 = arith.mulf %168, %174 : vector<1x128xf32>
    %178 = arith.addf %176, %177 : vector<1x128xf32>
    %179 = math.tanh %178 : vector<1x128xf32>
    %180 = arith.mulf %175, %179 : vector<1x128xf32>
    %c6 = arith.constant 6 : index
    %c0_63 = arith.constant 0 : index
    %181 = vector.load %arg10[%c6, %c0_63] : memref<8x128xf32, #tpu.memory_space<vmem>>, vector<1x128xf32>
    tpu.vector_store %arg10[%c6, %c0_63], %180 {strides = array<i32>} : memref<8x128xf32, #tpu.memory_space<vmem>>, vector<1x128xf32>,
    %182 = vector.extract_strided_slice %13 {offsets = [7, 0], sizes = [1, 512], strides = [1, 1]} : vector<8x512xf32> to vector<1x512xf32>
    %183 = arith.truncf %180 : vector<1x128xf32> to vector<1x128xbf16>
    %c0_64 = arith.constant 0 : index
    %c0_65 = arith.constant 0 : index
    %184 = vector.load %arg6[%c0_64, %c0_65] : memref<128x512xbf16, #tpu.memory_space<vmem>>, vector<128x512xbf16>
    %cst_66 = arith.constant dense<0.000000e+00> : vector<1x512xf32>
    %185 = tpu.matmul %183, %184, %cst_66 {dimension_numbers = #tpu.dot_dimension_numbers<[1], [0], [0], [1], [0, 0, 1, 1], [], []>} : vector<1x128xbf16>, vector<128x512xbf16>, vector<1x512xf32> -> vector<1x512xf32>
    %186 = arith.addf %182, %185 : vector<1x512xf32>
    %187 = arith.negf %186 : vector<1x512xf32>
    %188 = math.exp %187 : vector<1x512xf32>
    %cst_67 = arith.constant 1.000000e+00 : f32
    %189 = vector.broadcast %cst_67 : f32 to vector<1x512xf32>
    %190 = arith.addf %189, %188 : vector<1x512xf32>
    %191 = arith.divf %189, %190 : vector<1x512xf32>
    %192 = vector.extract_strided_slice %191 {offsets = [0, 0], sizes = [1, 128], strides = [1, 1]} : vector<1x512xf32> to vector<1x128xf32>
    %193 = vector.extract_strided_slice %191 {offsets = [0, 128], sizes = [1, 128], strides = [1, 1]} : vector<1x512xf32> to vector<1x128xf32>
    %194 = vector.extract_strided_slice %191 {offsets = [0, 256], sizes = [1, 128], strides = [1, 1]} : vector<1x512xf32> to vector<1x128xf32>
    %cst_68 = arith.constant 2.000000e+00 : f32
    %195 = vector.broadcast %cst_68 : f32 to vector<1x128xf32>
    %196 = arith.mulf %195, %194 : vector<1x128xf32>
    %cst_69 = arith.constant 1.000000e+00 : f32
    %197 = vector.broadcast %cst_69 : f32 to vector<1x128xf32>
    %198 = arith.subf %196, %197 : vector<1x128xf32>
    %199 = vector.extract_strided_slice %191 {offsets = [0, 384], sizes = [1, 128], strides = [1, 1]} : vector<1x512xf32> to vector<1x128xf32>
    %200 = arith.mulf %193, %178 : vector<1x128xf32>
    %201 = arith.mulf %192, %198 : vector<1x128xf32>
    %202 = arith.addf %200, %201 : vector<1x128xf32>
    %203 = math.tanh %202 : vector<1x128xf32>
    %204 = arith.mulf %199, %203 : vector<1x128xf32>
    %c7 = arith.constant 7 : index
    %c0_70 = arith.constant 0 : index
    %205 = vector.load %arg10[%c7, %c0_70] : memref<8x128xf32, #tpu.memory_space<vmem>>, vector<1x128xf32>
    tpu.vector_store %arg10[%c7, %c0_70], %204 {strides = array<i32>} : memref<8x128xf32, #tpu.memory_space<vmem>>, vector<1x128xf32>,
    %c0_71 = arith.constant 0 : index
    %c0_72 = arith.constant 0 : index
    %206 = vector.load %arg10[%c0_71, %c0_72] : memref<8x128xf32, #tpu.memory_space<vmem>>, vector<8x128xf32>
    %207 = arith.truncf %206 : vector<8x128xf32> to vector<8x128xbf16>
    %c0_73 = arith.constant 0 : index
    %c0_74 = arith.constant 0 : index
    %208 = vector.load %arg7[%c0_73, %c0_74] : memref<128x256xbf16, #tpu.memory_space<vmem>>, vector<128x256xbf16>
    %cst_75 = arith.constant dense<0.000000e+00> : vector<8x256xf32>
    %209 = tpu.matmul %207, %208, %cst_75 {dimension_numbers = #tpu.dot_dimension_numbers<[1], [0], [0], [1], [0, 0, 1, 1], [], []>} : vector<8x128xbf16>, vector<128x256xbf16>, vector<8x256xf32> -> vector<8x256xf32>
    %c0_76 = arith.constant 0 : index
    %c0_77 = arith.constant 0 : index
    %210 = vector.load %arg8[%c0_76, %c0_77] : memref<1x256xf32, #tpu.memory_space<vmem>>, vector<1x256xf32>
    %211 = vector.broadcast %210 : vector<1x256xf32> to vector<8x256xf32>
    %212 = arith.addf %209, %211 : vector<8x256xf32>
    %c0_78 = arith.constant 0 : index
    %c0_79 = arith.constant 0 : index
    %213 = vector.load %arg9[%c0_78, %c0_79] : memref<8x256xf32, #tpu.memory_space<vmem>>, vector<8x256xf32>
    tpu.vector_store %arg9[%c0_78, %c0_79], %212 {strides = array<i32>} : memref<8x256xf32, #tpu.memory_space<vmem>>, vector<8x256xf32>,
    return
  }
}

</mosaic_0001>

<bundles_post_ra>
// kernel: tpu_custom_call.1
= control target key start
LH: loop header
LB: loop body
LE: loop exit
PB: predicated region body
PF: predicated region fallthrough
CT: control target
= control target key end

     0   :  { %14 = vsyncpa [#allocation4], 0  ;;  %s4852_s0 = inlined_call_operand.hbm [shape: bf16[1,384], index: 0, kind: input, shape index: {}]   ;;  %s4853_s1 = inlined_call_operand.hbm [shape: bf16[384,128], index: 1, kind: input, shape index: {}]   ;;  %s4854_s2 = inlined_call_operand.vmem [shape: f32[1,128], index: 2, kind: input, shape index: {}]   ;;  %s4855_s3 = inlined_call_operand.vmem [shape: bf16[8,32], index: 3, kind: input, shape index: {}]   ;;  %s4856_s4 = inlined_call_operand.hbm [shape: bf16[32,512], index: 4, kind: input, shape index: {}]   ;;  %s4857_s5 = inlined_call_operand.vmem [shape: f32[1,512], index: 5, kind: input, shape index: {}]   ;;  %s4858_s6 = inlined_call_operand.hbm [shape: bf16[128,512], index: 6, kind: input, shape index: {}]   ;;  %s4859_s7 = inlined_call_operand.hbm [shape: bf16[128,256], index: 7, kind: input, shape index: {}]   ;;  %s4860_s8 = inlined_call_operand.vmem [shape: f32[1,256], index: 8, kind: input, shape index: {}]   ;;  %s4861_s9 = inlined_call_operand.hbm [shape: f32[8,256], index: 9, kind: output, shape index: {}]  }
   0x1   :  { %15 = vsyncpa [#allocation7], 0 }
   0x2   :  { %16 = vsyncpa [#allocation10], 0 }
   0x3   :  { %17 = vsyncpa [#allocation5], 0  ;;  %s4199_s30 = smov [#allocation6]   ;;  %s4059_s13 = scalar_lea.hbm %s4853_s1, 3072 }
   0x4   :  { %s33_s10 = sshll.u32 %s4199_s30, 4  ;;  %p4060_p0 = scmp.ne.s32.totalorder %s4853_s1, %s4059_s13  ;;  %s34_s10 = int_to_ptr.vmem [resolvable:$true] %s33_s10 }
   0x5   :  { %p4063_p1 = scmp.lt.u32.totalorder %s4059_s13, %s4853_s1 }
   0x7   :  { %p4065_p2 = pnand %p4063_p1, %p4060_p0 }
   0x9   :  { %4068 = shalt.err (!%p4065_p2)
}
   0xa   :  { %s4069_s18 = scalar_lea.vmem %s34_s10, 3072  ;;  %p4074_p4 = scmp.lt.s32.totalorder %s34_s10, %s34_s10 }
   0xb   :  { %p4070_p3 = scmp.ne.s32.totalorder %s34_s10, %s4069_s18  ;;  %p4075_p5 = scmp.lt.s32.totalorder %s4069_s18, %s4069_s18 }
   0xd   :  { %p4076_p6 = por %p4075_p5, %p4074_p4 }
   0xf   :  { %p4077_p7 = pnand %p4076_p6, %p4070_p3 }
  0x11   :  { %4080 = shalt.err (!%p4077_p7)
}
  0x12   :  { %s4200_s19 = smov 64   ;;  %s4201_s20 = smov 4  }
  0x13   :  { %39 = dma.hbm_to_vmem [thread:$0]  %s4853_s1, 3072, %s34_s10, [#allocation7], %s4200_s19, %s4200_s19, %s4201_s20  }
  0x14   :  { %s4202_s23 = smov [#allocation9]   ;;  %s4203_s25 = smov [#allocation3]  }
  0x15   :  { %s63_s24 = sshll.u32 %s4202_s23, 4  ;;  %s24_s26 = sshll.u32 %s4203_s25, 4  ;;  %s64_s24 = int_to_ptr.vmem [resolvable:$true] %s63_s24  ;;  %s25_s26 = int_to_ptr.vmem [resolvable:$true] %s24_s26 }
  0x16   :  { %s4081_s29 = scalar_lea.hbm %s4858_s6, 4096 }
  0x17   :  { %p4082_p8 = scmp.ne.s32.totalorder %s4858_s6, %s4081_s29  ;;  %p4085_p9 = scmp.lt.u32.totalorder %s4081_s29, %s4858_s6 }
  0x19   :  { %p4087_p10 = pnand %p4085_p9, %p4082_p8 }
  0x1b   :  { %4090 = shalt.err (!%p4087_p10)
}
  0x1c   :  { %s4091_s1 = scalar_lea.vmem %s64_s24, 4096  ;;  %p4096_p12 = scmp.lt.s32.totalorder %s64_s24, %s64_s24 }
  0x1d   :  { %p4092_p11 = scmp.ne.s32.totalorder %s64_s24, %s4091_s1  ;;  %p4097_p13 = scmp.lt.s32.totalorder %s4091_s1, %s4091_s1 }
  0x1f   :  { %p4098_p0 = por %p4097_p13, %p4096_p12 }
  0x21   :  { %p4099_p1 = pnand %p4098_p0, %p4092_p11 }
  0x23   :  { %4102 = shalt.err (!%p4099_p1)
}
  0x24   :  { %s4204_s10 = smov 256   ;;  %s4205_s14 = smov 16  }
  0x25   :  { %69 = dma.hbm_to_vmem [thread:$0]  %s4858_s6, 4096, %s64_s24, [#allocation10], %s4204_s10, %s4204_s10, %s4205_s14  }
  0x26   :  { %s4103_s19 = scalar_lea.hbm %s4852_s0, 48 }
  0x27   :  { %p4104_p2 = scmp.ne.s32.totalorder %s4852_s0, %s4103_s19  ;;  %p4107_p3 = scmp.lt.u32.totalorder %s4103_s19, %s4852_s0 }
  0x29   :  { %p4109_p4 = pnand %p4107_p3, %p4104_p2 }
  0x2b   :  { %4112 = shalt.err (!%p4109_p4)
}
  0x2c   :  { %s4113_s25 = scalar_lea.vmem %s25_s26, 48  ;;  %s4117_s27 = scalar_lea.vmem %s25_s26, 64 }
  0x2d   :  { %p4114_p5 = scmp.ne.s32.totalorder %s25_s26, %s4113_s25  ;;  %p4118_p6 = scmp.lt.s32.totalorder %s25_s26, %s25_s26 }
  0x2e   :  { %p4119_p7 = scmp.lt.s32.totalorder %s4117_s27, %s4113_s25 }
  0x30   :  { %p4120_p8 = por %p4119_p7, %p4118_p6 }
  0x32   :  { %p4121_p9 = pnand %p4120_p8, %p4114_p5 }
  0x34   :  { %4124 = shalt.err (!%p4121_p9)
}
  0x35   :  { %27 = dma.hbm_to_vmem [thread:$0]  %s4852_s0, 48, %s25_s26, [#allocation4]  }
  0x36   :  { %s4206_s28 = smov [#allocation8]   ;;  %s4207_s30 = smov [#allocation11]  }
  0x37   :  { %s49_s29 = sshll.u32 %s4206_s28, 4  ;;  %s75_s11 = sshll.u32 %s4207_s30, 4  ;;  %s50_s29 = int_to_ptr.vmem [resolvable:$true] %s49_s29  ;;  %s76_s11 = int_to_ptr.vmem [resolvable:$true] %s75_s11 }
  0x38   :  { %s4125_s1 = scalar_lea.hbm %s4856_s4, 1024 }
  0x39   :  { %p4126_p10 = scmp.ne.s32.totalorder %s4856_s4, %s4125_s1  ;;  %p4129_p11 = scmp.lt.u32.totalorder %s4125_s1, %s4856_s4 }
  0x3b   :  { %p4131_p12 = pnand %p4129_p11, %p4126_p10 }
  0x3d   :  { %4134 = shalt.err (!%p4131_p12)
}
  0x3e   :  { %s4135_s0 = scalar_lea.vmem %s50_s29, 1024  ;;  %p4140_p0 = scmp.lt.s32.totalorder %s50_s29, %s50_s29 }
  0x3f   :  { %p4136_p13 = scmp.ne.s32.totalorder %s50_s29, %s4135_s0  ;;  %p4141_p1 = scmp.lt.s32.totalorder %s4135_s0, %s4135_s0 }
  0x41   :  { %p4142_p2 = por %p4141_p1, %p4140_p0 }
  0x43   :  { %p4143_p3 = pnand %p4142_p2, %p4136_p13 }
  0x45   :  { %4146 = shalt.err (!%p4143_p3)
}
  0x46   :  { %55 = dma.hbm_to_vmem [thread:$0]  %s4856_s4, 1024, %s50_s29, [#allocation7], %s4204_s10, %s4204_s10, %s4205_s14  }
  0x47   :  { %s4147_s22 = scalar_lea.hbm %s4859_s7, 2048 }
  0x48   :  { %p4148_p4 = scmp.ne.s32.totalorder %s4859_s7, %s4147_s22  ;;  %p4151_p5 = scmp.lt.u32.totalorder %s4147_s22, %s4859_s7 }
  0x4a   :  { %p4153_p6 = pnand %p4151_p5, %p4148_p4 }
  0x4c   :  { %4156 = shalt.err (!%p4153_p6)
}
  0x4d   :  { %s4157_s24 = scalar_lea.vmem %s76_s11, 2048  ;;  %p4162_p8 = scmp.lt.s32.totalorder %s76_s11, %s76_s11 }
  0x4e   :  { %p4158_p7 = scmp.ne.s32.totalorder %s76_s11, %s4157_s24  ;;  %p4163_p9 = scmp.lt.s32.totalorder %s4157_s24, %s4157_s24 }
  0x50   :  { %p4164_p10 = por %p4163_p9, %p4162_p8 }
  0x52   :  { %p4165_p11 = pnand %p4164_p10, %p4158_p7 }
  0x54   :  { %4168 = shalt.err (!%p4165_p11)
}
  0x55   :  { %s4208_s4 = smov 128   ;;  %s4209_s10 = smov 8  }
  0x56   :  { %81 = dma.hbm_to_vmem [thread:$0]  %s4859_s7, 2048, %s76_s11, [#allocation10], %s4208_s4, %s4208_s4, %s4209_s10  }
  0x57   :  { %4191 = dma.done.wait [#allocation4], 48  }
  0x58   :  { %4192 = vsyncadd [#allocation4], 4294967248 }
  0x59   :  { %4193 = dma.done.wait [#allocation7], 4096  }
  0x5a   :  { %4194 = vsyncadd [#allocation7], 4294963200 }
  0x5b   :  { %4195 = dma.done.wait [#allocation10], 6144  }
  0x5c   :  { %4196 = vsyncadd [#allocation10], 4294961152  ;;  %v4210_v0 = vmov 0.0   ;;  %vm4211_vm0 = vmmov 0   ;;  %v3759_v1 = vld [vmem:[#allocation6 + $0x40] sm:$0xff]   ;;  %v3762_v4 = vld [vmem:[#allocation6 + $0x48] sm:$0xff]   ;;  %v162_v17 = vlaneseq }
  0x5d   :  { %3723 = vmatprep.subr.bf16.mxu1 %v4210_v0  ;;  %3739 = vmatprep.mubr.msk.bf16.mxu1 %vm4211_vm0, %v4210_v0  ;;  %v3760_v2 = vld [vmem:[#allocation6] sm:$0xff]   ;;  %v3763_v5 = vld [vmem:[#allocation6 + $0x8] sm:$0xff]   ;;  %v3765_v7 = vld [vmem:[#allocation6 + $0x50] sm:$0xff]   ;;  %v4212_v15 = vmov 1966171168   ;;  %v4213_v44 = vmov 0  }
  0x5e   :  { %3692 = vmatprep.subr.bf16.mxu0 %v3759_v1  ;;  %v3761_v3 = vld [vmem:[#allocation6 + $0x80] sm:$0xff]   ;;  %v3764_v6 = vld [vmem:[#allocation6 + $0x88] sm:$0xff]   ;;  %v3766_v8 = vld [vmem:[#allocation6 + $0x10] sm:$0xff]   ;;  %v160_v16 = vunpack.c.l.s4 %v4212_v15  ;;  %v4337_v22 = vshrl.u32 %v162_v17, 7  ;;  %vm473_vm1 = vcmask 261120   ;;  %s4214_s13 = smov [#allocation12]  }
  0x5f   :  { %3693 = vmatpush3.bf16.msra.mxu0 %v3760_v2  ;;  %3724 = vmatpush3.bf16.msra.mxu1 %v3761_v3  ;;  %v3767_v9 = vld [vmem:[#allocation6 + $0x90] sm:$0xff]   ;;  %v3768_v10 = vld [vmem:[#allocation6 + $0x58] sm:$0xff]   ;;  %v3771_v13 = vld [vmem:[#allocation6 + $0x60] sm:$0xff]   ;;  %s3334_s1 = sshll.u32 %s4214_s13, 4  ;;  %s3335_s1 = int_to_ptr.vmem [resolvable:$true] %s3334_s1 }
  0x60   :  { %3694 = vmatprep.subr.bf16.mxu0 %v3762_v4  ;;  %3725 = vmatprep.subr.bf16.mxu1 %v4210_v0  ;;  %v3769_v11 = vld [vmem:[#allocation6 + $0x18] sm:$0xff]   ;;  %v3772_v14 = vld [vmem:[#allocation6 + $0x20] sm:$0xff]   ;;  %v3774_v19 = vld [vmem:[#allocation6 + $0x68] sm:$0xff]   ;;  %v161_v21 = vunpack.c.0.s8 %v160_v16  ;;  %s4169_s15 = scalar_lea.vmem %s3335_s1, 256  ;;  %p4174_p13 = scmp.lt.s32.totalorder %s3335_s1, %s3335_s1 }
  0x61   :  { %v3770_v12 = vld [vmem:[#allocation6 + $0x98] sm:$0xff]   ;;  %v3773_v18 = vld [vmem:[#allocation6 + $0xa0] sm:$0xff]   ;;  %v3775_v20 = vld [vmem:[#allocation6 + $0x28] sm:$0xff]   ;;  %p4170_p12 = scmp.ne.s32.totalorder %s3335_s1, %s4169_s15  ;;  %p4175_p0 = scmp.lt.s32.totalorder %s4169_s15, %s4169_s15 }
  0x62   :  { %v3776_v23 = vld [vmem:[#allocation6 + $0xa8] sm:$0xff]   ;;  %v3777_v24 = vld [vmem:[#allocation6 + $0x70] sm:$0xff]   ;;  %v164_v27 = vsub.s32 %v161_v21, %v4337_v22  ;;  %v3345_v28 = vld.sshfl [vmem:[#allocation3] sm:$0x13 pattern:$0x75316420] }
  0x63   :  { %3695 = vmatpush3.bf16.msra.mxu0 %v3763_v5  ;;  %3726 = vmatpush3.bf16.msra.mxu1 %v3764_v6  ;;  %v3778_v25 = vld [vmem:[#allocation6 + $0x30] sm:$0xff]   ;;  %v3780_v29 = vld [vmem:[#allocation6 + $0x78] sm:$0xff]   ;;  %v158_v30 = vcombine.high %v3345_v28, %v3345_v28  ;;  %v402_v47 = vld [vmem:[%s4855_s3] sm:$0xf]  ;;  %p4176_p1 = por %p4175_p0, %p4174_p13 }
  0x64   :  { %3696 = vmatprep.subr.bf16.mxu0 %v3765_v7  ;;  %3727 = vmatprep.subr.bf16.mxu1 %v4210_v0  ;;  %v3779_v26 = vld [vmem:[#allocation6 + $0xb0] sm:$0xff]   ;;  %v3781_v32 = vld [vmem:[#allocation6 + $0x38] sm:$0xff]   ;;  %v165_v33 = vrot.slane %v3345_v28, %v164_v27  ;;  %v149_v16 = vld [vmem:[%s4854_s2] sm:$0x1] }
  0x65   :  { %v172_v31 = vrot.slane %v158_v30, %v164_v27  ;;  %v3782_v34 = vld [vmem:[#allocation6 + $0xb8] sm:$0xff]   ;;  %v3785_v35 = vld [vmem:[#allocation8 + $0x4] ss:$16 sps:$4 sm:$0xff]   ;;  %v4343_v37 = vld [vmem:[#allocation9] ss:$16 sps:$4 sm:$0xff]   ;;  %p4177_p2 = pnand %p4176_p1, %p4170_p12 }
  0x66   :  { %v173_v36 = vcombine.high %v165_v33, %v165_v33  ;;  %v4345_v38 = vld [vmem:[#allocation9 + $0x4] ss:$16 sps:$4 sm:$0xff]   ;;  %v3783_v39 = vld [vmem:[#allocation8] ss:$16 sps:$4 sm:$0xff]   ;;  %v3791_v46 = vld [vmem:[#allocation8 + $0xc] ss:$16 sps:$4 sm:$0xff]  }
  0x67   :  { %3697 = vmatpush3.bf16.msra.mxu0 %v3766_v8  ;;  %3728 = vmatpush3.bf16.msra.mxu1 %v3767_v9  ;;  %v3788_v40 = vld [vmem:[#allocation8 + $0x24] ss:$16 sps:$4 sm:$0xff]   ;;  %v4351_v42 = vld [vmem:[#allocation9 + $0x20] ss:$16 sps:$4 sm:$0xff]   ;;  %v3789_v49 = vld [vmem:[#allocation8 + $0x8] ss:$16 sps:$4 sm:$0xff]  }
  0x68   :  { %3698 = vmatprep.subr.bf16.mxu0 %v3768_v10  ;;  %3729 = vmatprep.subr.bf16.mxu1 %v4210_v0  ;;  %v4348_v41 = vld [vmem:[#allocation9 + $0x24] ss:$16 sps:$4 sm:$0xff]   ;;  %v3786_v43 = vld [vmem:[#allocation8 + $0x20] ss:$16 sps:$4 sm:$0xff]   ;;  %v3794_v50 = vld [vmem:[#allocation8 + $0x2c] ss:$16 sps:$4 sm:$0xff]  }
  0x69   :  { %353 = vmatprep.mubr.bf16.mxu0 %v172_v31  ;;  %v4354_v45 = vld [vmem:[#allocation9 + $0x44] ss:$16 sps:$4 sm:$0xff]   ;;  %v4362_v48 = vld [vmem:[#allocation9 + $0x40] ss:$16 sps:$4 sm:$0xff]   ;;  %v3792_v52 = vld [vmem:[#allocation8 + $0x28] ss:$16 sps:$4 sm:$0xff]  }
  0x6a   :  { %v4365_v51 = vld [vmem:[#allocation9 + $0x64] ss:$16 sps:$4 sm:$0xff]   ;;  %v4368_v53 = vld [vmem:[#allocation9 + $0xc] ss:$16 sps:$4 sm:$0xff]   ;;  %v4371_v54 = vld [vmem:[#allocation9 + $0x60] ss:$16 sps:$4 sm:$0xff]  }
  0x6b   :  { %3699 = vmatpush3.bf16.msra.mxu0 %v3769_v11  ;;  %3730 = vmatpush3.bf16.msra.mxu1 %v3770_v12  ;;  %v4373_v55 = vld [vmem:[#allocation9 + $0x84] ss:$16 sps:$4 sm:$0xff]   ;;  %v4377_v56 = vld [vmem:[#allocation9 + $0x80] ss:$16 sps:$4 sm:$0xff]   ;;  %v4379_v57 = vld [vmem:[#allocation9 + $0x8] ss:$16 sps:$4 sm:$0xff]  }
  0x6c   :  { %3700 = vmatprep.subr.bf16.mxu0 %v3771_v13  ;;  %3731 = vmatprep.subr.bf16.mxu1 %v4210_v0  ;;  %v4381_v58 = vld [vmem:[#allocation9 + $0x2c] ss:$16 sps:$4 sm:$0xff]   ;;  %v4386_v59 = vld [vmem:[#allocation9 + $0x28] ss:$16 sps:$4 sm:$0xff]   ;;  %v4412_v2 = vld [vmem:[#allocation9 + $0xa4] ss:$16 sps:$4 sm:$0xff]  }
  0x6d   :  { %v4389_v60 = vld [vmem:[#allocation9 + $0x4c] ss:$16 sps:$4 sm:$0xff]   ;;  %v4395_v61 = vld [vmem:[#allocation9 + $0x48] ss:$16 sps:$4 sm:$0xff]   ;;  %v4416_v4 = vld [vmem:[#allocation9 + $0xa0] ss:$16 sps:$4 sm:$0xff]  }
  0x6e   :  { %v4397_v62 = vld [vmem:[#allocation9 + $0x6c] ss:$16 sps:$4 sm:$0xff]   ;;  %v4401_v63 = vld [vmem:[#allocation9 + $0x68] ss:$16 sps:$4 sm:$0xff]   ;;  %v4424_v6 = vld [vmem:[#allocation9 + $0xc4] ss:$16 sps:$4 sm:$0xff]  }
  0x6f   :  { %3701 = vmatpush3.bf16.msra.mxu0 %v3772_v14  ;;  %3732 = vmatpush3.bf16.msra.mxu1 %v3773_v18  ;;  %v4408_v1 = vld [vmem:[#allocation9 + $0x88] ss:$16 sps:$4 sm:$0xff]   ;;  %v4414_v3 = vld [vmem:[#allocation9 + $0xac] ss:$16 sps:$4 sm:$0xff]   ;;  %v4428_v8 = vld [vmem:[#allocation9 + $0xc0] ss:$16 sps:$4 sm:$0xff]  }
  0x70   :  { %3702 = vmatprep.subr.bf16.mxu0 %v3774_v19  ;;  %3733 = vmatprep.subr.bf16.mxu1 %v4210_v0  ;;  %v4418_v5 = vld [vmem:[#allocation9 + $0xa8] ss:$16 sps:$4 sm:$0xff]   ;;  %v4426_v7 = vld [vmem:[#allocation9 + $0xcc] ss:$16 sps:$4 sm:$0xff]   ;;  %v4436_v10 = vld [vmem:[#allocation9 + $0xe4] ss:$16 sps:$4 sm:$0xff]  }
  0x71   :  { %v4430_v9 = vld [vmem:[#allocation9 + $0xc8] ss:$16 sps:$4 sm:$0xff]   ;;  %v4438_v11 = vld [vmem:[#allocation9 + $0xec] ss:$16 sps:$4 sm:$0xff]   ;;  %v4440_v12 = vld [vmem:[#allocation9 + $0xe0] ss:$16 sps:$4 sm:$0xff]  }
  0x72   :  { %v4442_v13 = vld [vmem:[#allocation9 + $0xe8] ss:$16 sps:$4 sm:$0xff]  }
  0x73   :  { %3703 = vmatpush3.bf16.msra.mxu0 %v3775_v20  ;;  %3734 = vmatpush3.bf16.msra.mxu1 %v3776_v23 }
  0x74   :  { %3704 = vmatprep.subr.bf16.mxu0 %v3777_v24  ;;  %3735 = vmatprep.subr.bf16.mxu1 %v4210_v0 }
  0x77   :  { %3705 = vmatpush3.bf16.msra.mxu0 %v3778_v25  ;;  %3736 = vmatpush3.bf16.msra.mxu1 %v3779_v26 }
  0x78   :  { %3706 = vmatprep.subr.bf16.mxu0 %v3780_v29  ;;  %3737 = vmatprep.subr.bf16.mxu1 %v4210_v0  ;;  %v4403_v0 = vld [vmem:[#allocation9 + $0x8c] ss:$16 sps:$4 sm:$0xff]  }
  0x7b   :  { %3707 = vmatpush3.bf16.msra.mxu0 %v3781_v32  ;;  %3738 = vmatpush3.bf16.msra.mxu1 %v3782_v34 }
  0x7c   :  { %477 = vmatprep.subr.bf16.mxu1 %v3785_v35  ;;  %752 = vmatprep.subr.bf16.mxu0 %v4345_v38 }
  0x7e   :  { %354 = vmatmul.mubr.bf16.vlgmr.msra.gmra.mrb[0].mxu0 %v165_v33  ;;  %3740 = vmatmul.mubr.bf16.vlgmr.msra.gmra.mrb[0].mxu1 %v173_v36 }
  0x7f   :  { %753 = vmatpush1.bf16.msra.mxu0 %v4343_v37  ;;  %478 = vmatpush1.bf16.msra.mxu1 %v3783_v39  ;;  %v415_v39 = vsub.s32 0, %v4337_v22 }
  0x80   :  { %509 = vmatprep.mubr.bf16.mxu1 %v4213_v44  ;;  %479 = vmatprep.subr.bf16.mxu1 %v3788_v40  ;;  %v423_v40 = vsub.s32 2, %v4337_v22 }
  0x81   :  { %754 = vmatprep.subr.bf16.mxu0 %v4348_v41  ;;  %784 = vmatprep.mubr.bf16.mxu0 %v4213_v44 }
  0x83   :  { %755 = vmatpush1.bf16.msra.mxu0 %v4351_v42  ;;  %480 = vmatpush1.bf16.msra.mxu1 %v3786_v43  ;;  %v411_v43 = vld [vmem:[%s4857_s5] sm:$0xf] }
  0x84   :  { %756 = vmatprep.subr.bf16.mxu0 %v4354_v45  ;;  %518 = vmatprep.subr.bf16.mxu1 %v3791_v46  ;;  %v419_v46 = vsub.s32 1, %v4337_v22 }
  0x86   :  { %3378 = vmatmul.mubr.msk.bf16.vlgmr.msra.gmra.mrb[4].mxu1 %vm473_vm1, %v402_v47 }
  0x87   :  { %757 = vmatpush1.bf16.msra.mxu0 %v4362_v48  ;;  %519 = vmatpush1.bf16.msra.mxu1 %v3789_v49  ;;  %v424_v49 = vrot.slane %v411_v43, %v423_v40 }
  0x88   :  { %550 = vmatprep.mubr.bf16.mxu1 %v4213_v44  ;;  %520 = vmatprep.subr.bf16.mxu1 %v3794_v50  ;;  %v420_v50 = vrot.slane %v411_v43, %v419_v46 }
  0x89   :  { %758 = vmatprep.subr.bf16.mxu0 %v4365_v51 }
  0x8b   :  { %759 = vmatpush1.bf16.msra.mxu0 %v4371_v54  ;;  %521 = vmatpush1.bf16.msra.mxu1 %v3792_v52 }
  0x8c   :  { %760 = vmatprep.subr.bf16.mxu0 %v4373_v55  ;;  %793 = vmatprep.subr.bf16.mxu1 %v4368_v53 }
  0x8e   :  { %3379 = vmatmul.mubr.msk.bf16.vlgmr.msra.gmra.mrb[8].mxu1 %vm473_vm1, %v402_v47  ;;  %v416_v47 = vrot.slane %v411_v43, %v415_v39 }
  0x8f   :  { %761 = vmatpush1.bf16.msra.mxu0 %v4377_v56  ;;  %794 = vmatpush1.bf16.msra.mxu1 %v4379_v57 }
  0x90   :  { %825 = vmatprep.mubr.bf16.mxu1 %v4213_v44  ;;  %795 = vmatprep.subr.bf16.mxu1 %v4381_v58 }
  0x91   :  { %762 = vmatprep.subr.bf16.mxu0 %v4412_v2 }
  0x93   :  { %796 = vmatpush1.bf16.msra.mxu1 %v4386_v59  ;;  %763 = vmatpush1.bf16.msra.mxu0 %v4416_v4 }
  0x94   :  { %797 = vmatprep.subr.bf16.mxu1 %v4389_v60  ;;  %764 = vmatprep.subr.bf16.mxu0 %v4424_v6 }
  0x97   :  { %798 = vmatpush1.bf16.msra.mxu1 %v4395_v61  ;;  %765 = vmatpush1.bf16.msra.mxu0 %v4428_v8 }
  0x98   :  { %799 = vmatprep.subr.bf16.mxu1 %v4397_v62  ;;  %766 = vmatprep.subr.bf16.mxu0 %v4436_v10 }
  0x9b   :  { %800 = vmatpush1.bf16.msra.mxu1 %v4401_v63  ;;  %767 = vmatpush1.bf16.msra.mxu0 %v4440_v12 }
  0x9c   :  { %801 = vmatprep.subr.bf16.mxu1 %v4403_v0  ;;  %1063 = vmatprep.subr.bf16.mxu0 %v4345_v38 }
  0x9f   :  { %802 = vmatpush1.bf16.msra.mxu1 %v4408_v1 }
  0xa0   :  { %803 = vmatprep.subr.bf16.mxu1 %v4414_v3 }
  0xa3   :  { %804 = vmatpush1.bf16.msra.mxu1 %v4418_v5 }
  0xa4   :  { %805 = vmatprep.subr.bf16.mxu1 %v4426_v7 }
  0xa7   :  { %806 = vmatpush1.bf16.msra.mxu1 %v4430_v9 }
  0xa8   :  { %807 = vmatprep.subr.bf16.mxu1 %v4438_v11 }
  0xab   :  { %808 = vmatpush1.bf16.msra.mxu1 %v4442_v13 }
  0xac   :  { %1104 = vmatprep.subr.bf16.mxu1 %v4368_v53 }
 0x151   :  { %v3708_v14 = vpop.f32.mrb[0].mxu0  ;;  %v395_v17 = vpop.f32.mrb[0].mxu1 }
 0x152   :  { %v3709_v15 = vpop.f32.mrb[1].mxu0  ;;  %v3741_v20 = vpop.f32.mrb[1].mxu1 }
 0x153   :  { %v3710_v18 = vadd.f32 %v3709_v15, %v3708_v14  ;;  %v3711_v19 = vpop.f32.mrb[2].mxu0  ;;  %v398_v23 = vpop.f32.mrb[2].mxu1 }
 0x154   :  { %v3712_v21 = vpop.f32.mrb[3].mxu0  ;;  %v3742_v25 = vpop.f32.mrb[3].mxu1  ;;  %v427_v23 = vsub.s32 3, %v4337_v22 }
 0x155   :  { %v356_v24 = vadd.f32 %v3710_v18, %v149_v16 }
 0x157   :  { %v396_v26 = vadd.f32 %v395_v17, %v356_v24 }
 0x159   :  { %v401_v27 = vmax.f32 %v396_v26, 0.0  ;;  %v511_v28 = vpop.f32.mrb[4].mxu1 }
 0x15a   :  { %v513_v30 = vpop.f32.mrb[5].mxu1  ;;  %v4497_v52 = vadd.f32 %v511_v28, %v416_v47 }
 0x15b   :  { %v559_v29 = vpack.c.bf16 %v401_v27, %v401_v27  ;;  %v515_v31 = vpop.f32.mrb[6].mxu1  ;;  %v4501_v15 = vadd.f32 %v513_v30, %v420_v50 }
 0x15c   :  { %v516_v32 = vpop.f32.mrb[7].mxu1 }
 0x15d   :  { %785 = vmatmul.mubr.bf16.vlgmr.msra.gmra.mrb[4].mxu0 %v559_v29  ;;  %826 = vmatmul.mubr.bf16.vlgmr.msra.gmra.mrb[12].mxu1 %v559_v29  ;;  %v428_v32 = vrot.slane %v411_v43, %v427_v23 }
 0x15e   :  { %1064 = vmatpush1.bf16.msra.mxu0 %v4343_v37  ;;  %1105 = vmatpush1.bf16.msra.mxu1 %v4379_v57 }
 0x15f   :  { %1065 = vmatprep.subr.bf16.mxu0 %v4348_v41  ;;  %1106 = vmatprep.subr.bf16.mxu1 %v4381_v58 }
 0x160   :  { %1095 = vmatprep.mubr.bf16.mxu0 %v4213_v44  ;;  %1136 = vmatprep.mubr.bf16.mxu1 %v4213_v44 }
 0x161   :  { %v552_v33 = vpop.f32.mrb[8].mxu1 }
 0x162   :  { %1066 = vmatpush1.bf16.msra.mxu0 %v4351_v42  ;;  %1107 = vmatpush1.bf16.msra.mxu1 %v4386_v59  ;;  %v554_v34 = vpop.f32.mrb[9].mxu1  ;;  %v4499_v14 = vadd.f32 %v552_v33, %v424_v49 }
 0x163   :  { %1067 = vmatprep.subr.bf16.mxu0 %v4354_v45  ;;  %1108 = vmatprep.subr.bf16.mxu1 %v4389_v60  ;;  %v556_v35 = vpop.f32.mrb[10].mxu1  ;;  %v4507_v33 = vadd.f32 %v554_v34, %v428_v32 }
 0x164   :  { %v557_v36 = vpop.f32.mrb[11].mxu1 }
 0x166   :  { %1068 = vmatpush1.bf16.msra.mxu0 %v4362_v48  ;;  %1109 = vmatpush1.bf16.msra.mxu1 %v4395_v61 }
 0x167   :  { %1069 = vmatprep.subr.bf16.mxu0 %v4365_v51  ;;  %1110 = vmatprep.subr.bf16.mxu1 %v4397_v62 }
 0x16a   :  { %1070 = vmatpush1.bf16.msra.mxu0 %v4371_v54  ;;  %1111 = vmatpush1.bf16.msra.mxu1 %v4401_v63 }
 0x16b   :  { %1071 = vmatprep.subr.bf16.mxu0 %v4373_v55  ;;  %1112 = vmatprep.subr.bf16.mxu1 %v4403_v0 }
 0x16e   :  { %1072 = vmatpush1.bf16.msra.mxu0 %v4377_v56  ;;  %1113 = vmatpush1.bf16.msra.mxu1 %v4408_v1 }
 0x16f   :  { %1073 = vmatprep.subr.bf16.mxu0 %v4412_v2  ;;  %1114 = vmatprep.subr.bf16.mxu1 %v4414_v3 }
 0x172   :  { %1074 = vmatpush1.bf16.msra.mxu0 %v4416_v4  ;;  %1115 = vmatpush1.bf16.msra.mxu1 %v4418_v5 }
 0x173   :  { %1075 = vmatprep.subr.bf16.mxu0 %v4424_v6  ;;  %1116 = vmatprep.subr.bf16.mxu1 %v4426_v7 }
 0x176   :  { %1076 = vmatpush1.bf16.msra.mxu0 %v4428_v8  ;;  %1117 = vmatpush1.bf16.msra.mxu1 %v4430_v9 }
 0x177   :  { %1077 = vmatprep.subr.bf16.mxu0 %v4436_v10  ;;  %1118 = vmatprep.subr.bf16.mxu1 %v4438_v11 }
 0x17a   :  { %1078 = vmatpush1.bf16.msra.mxu0 %v4440_v12  ;;  %1119 = vmatpush1.bf16.msra.mxu1 %v4442_v13 }
 0x17b   :  { %1393 = vmatprep.subr.bf16.mxu0 %v4345_v38  ;;  %1434 = vmatprep.subr.bf16.mxu1 %v4368_v53 }
 0x230   :  { %v786_v16 = vpop.f32.mrb[4].mxu0  ;;  %v827_v17 = vpop.f32.mrb[12].mxu1 }
 0x231   :  { %v834_v18 = vadd.f32 %v786_v16, %v4497_v52  ;;  %v836_v19 = vadd.f32 %v827_v17, %v4499_v14  ;;  %v788_v20 = vpop.f32.mrb[5].mxu0  ;;  %v829_v21 = vpop.f32.mrb[13].mxu1 }
 0x232   :  { %v835_v24 = vadd.f32 %v788_v20, %v4501_v15  ;;  %v790_v25 = vpop.f32.mrb[6].mxu0  ;;  %v831_v26 = vpop.f32.mrb[14].mxu1  ;;  %v837_v35 = vadd.f32 %v829_v21, %v4507_v33 }
 0x233   :  { %v3412_v27 = vmul.f32 -1.442695, %v834_v18  ;;  %v3414_v28 = vmul.f32 -1.442695, %v836_v19  ;;  %v791_v29 = vpop.f32.mrb[7].mxu0  ;;  %v832_v31 = vpop.f32.mrb[15].mxu1 }
 0x234   :  { %v3413_v30 = vmul.f32 -1.442695, %v835_v24  ;;  %v3415_v47 = vmul.f32 -1.442695, %v837_v35 }
 0x235   :  { %3915 = vpow2.f32 %v3412_v27 }
 0x236   :  { %3917 = vpow2.f32 %v3414_v28 }
 0x237   :  { %3919 = vpow2.f32 %v3413_v30 }
 0x23f   :  { %v3916_v36 = vpop.eup %3915 }
 0x240   :  { %v3918_v40 = vpop.eup %3917  ;;  %v850_v17 = vadd.f32 1.0, %v3916_v36 }
 0x241   :  { %v3920_v49 = vpop.eup %3919  ;;  %v852_v50 = vadd.f32 1.0, %v3918_v40 }
 0x242   :  { %v851_v16 = vadd.f32 1.0, %v3920_v49 }
 0x243   :  { %3921 = vrcp.f32 %v852_v50 }
 0x244   :  { %3923 = vpow2.f32 %v3415_v47 }
 0x245   :  { %3925 = vrcp.f32 %v851_v16 }
 0x246   :  { %3927 = vrcp.f32 %v850_v17 }
 0x24d   :  { %v3922_v18 = vpop.eup %3921 }
 0x24e   :  { %v3924_v19 = vpop.eup %3923  ;;  %v862_v43 = vmul.f32 2.0, %v3922_v18 }
 0x24f   :  { %v3926_v20 = vpop.eup %3925  ;;  %v853_v24 = vadd.f32 1.0, %v3924_v19 }
 0x250   :  { %v3416_v23 = vadd.f32 -1.0, %v862_v43  ;;  %v3928_v34 = vpop.eup %3927  ;;  %v864_v21 = vmul.f32 0.0, %v3926_v20 }
 0x251   :  { %3929 = vrcp.f32 %v853_v24 }
 0x252   :  { %v865_v25 = vmul.f32 %v3928_v34, %v3416_v23 }
 0x254   :  { %v4510_v26 = vadd.f32 %v865_v25, %v864_v21 }
 0x256   :  { %3931 = vtanh.f32 %v4510_v26 }
 0x25b   :  { %v3930_v27 = vpop.eup %3929 }
 0x260   :  { %v3932_v28 = vpop.eup %3931 }
 0x261   :  { %v868_v29 = vmul.f32 %v3932_v28, %v3930_v27 }
 0x263   :  { %869 = vst [vmem:[#allocation2] sm:$0x1] %v868_v29  ;;  %v870_v31 = vpack.c.bf16 %v868_v29, %v868_v29 }
 0x265   :  { %1096 = vmatmul.mubr.bf16.vlgmr.msra.gmra.mrb[8].mxu0 %v870_v31  ;;  %1137 = vmatmul.mubr.bf16.vlgmr.msra.gmra.mrb[16].mxu1 %v870_v31 }
 0x266   :  { %1394 = vmatpush1.bf16.msra.mxu0 %v4343_v37  ;;  %1435 = vmatpush1.bf16.msra.mxu1 %v4379_v57 }
 0x267   :  { %1395 = vmatprep.subr.bf16.mxu0 %v4348_v41  ;;  %1436 = vmatprep.subr.bf16.mxu1 %v4381_v58 }
 0x268   :  { %1425 = vmatprep.mubr.bf16.mxu0 %v4213_v44  ;;  %1466 = vmatprep.mubr.bf16.mxu1 %v4213_v44 }
 0x26a   :  { %1396 = vmatpush1.bf16.msra.mxu0 %v4351_v42  ;;  %1437 = vmatpush1.bf16.msra.mxu1 %v4386_v59 }
 0x26b   :  { %1397 = vmatprep.subr.bf16.mxu0 %v4354_v45  ;;  %1438 = vmatprep.subr.bf16.mxu1 %v4389_v60 }
 0x26e   :  { %1398 = vmatpush1.bf16.msra.mxu0 %v4362_v48  ;;  %1439 = vmatpush1.bf16.msra.mxu1 %v4395_v61 }
 0x26f   :  { %1399 = vmatprep.subr.bf16.mxu0 %v4365_v51  ;;  %1440 = vmatprep.subr.bf16.mxu1 %v4397_v62 }
 0x272   :  { %1400 = vmatpush1.bf16.msra.mxu0 %v4371_v54  ;;  %1441 = vmatpush1.bf16.msra.mxu1 %v4401_v63 }
 0x273   :  { %1401 = vmatprep.subr.bf16.mxu0 %v4373_v55  ;;  %1442 = vmatprep.subr.bf16.mxu1 %v4403_v0 }
 0x276   :  { %1402 = vmatpush1.bf16.msra.mxu0 %v4377_v56  ;;  %1443 = vmatpush1.bf16.msra.mxu1 %v4408_v1 }
 0x277   :  { %1403 = vmatprep.subr.bf16.mxu0 %v4412_v2  ;;  %1444 = vmatprep.subr.bf16.mxu1 %v4414_v3 }
 0x27a   :  { %1404 = vmatpush1.bf16.msra.mxu0 %v4416_v4  ;;  %1445 = vmatpush1.bf16.msra.mxu1 %v4418_v5 }
 0x27b   :  { %1405 = vmatprep.subr.bf16.mxu0 %v4424_v6  ;;  %1446 = vmatprep.subr.bf16.mxu1 %v4426_v7 }
 0x27e   :  { %1406 = vmatpush1.bf16.msra.mxu0 %v4428_v8  ;;  %1447 = vmatpush1.bf16.msra.mxu1 %v4430_v9 }
 0x27f   :  { %1407 = vmatprep.subr.bf16.mxu0 %v4436_v10  ;;  %1448 = vmatprep.subr.bf16.mxu1 %v4438_v11 }
 0x282   :  { %1408 = vmatpush1.bf16.msra.mxu0 %v4440_v12  ;;  %1449 = vmatpush1.bf16.msra.mxu1 %v4442_v13 }
 0x283   :  { %1722 = vmatprep.subr.bf16.mxu0 %v4345_v38  ;;  %1763 = vmatprep.subr.bf16.mxu1 %v4368_v53 }
 0x338   :  { %v1097_v30 = vpop.f32.mrb[8].mxu0  ;;  %v1138_v32 = vpop.f32.mrb[16].mxu1 }
 0x339   :  { %v1149_v35 = vrot.slane %v1097_v30, 7  ;;  %v1151_v36 = vrot.slane %v1138_v32, 7  ;;  %v1099_v40 = vpop.f32.mrb[9].mxu0  ;;  %v1140_v47 = vpop.f32.mrb[17].mxu1 }
 0x33a   :  { %v1150_v49 = vrot.slane %v1099_v40, 7  ;;  %v1101_v50 = vpop.f32.mrb[10].mxu0  ;;  %v1142_v16 = vpop.f32.mrb[18].mxu1  ;;  %v1152_v34 = vrot.slane %v1140_v47, 7 }
 0x33b   :  { %v1157_v17 = vadd.f32 %v1149_v35, %v4497_v52  ;;  %v1159_v18 = vadd.f32 %v1151_v36, %v4499_v14  ;;  %v1102_v19 = vpop.f32.mrb[11].mxu0  ;;  %v1143_v43 = vpop.f32.mrb[19].mxu1  ;;  %v1188_v36 = vrot.slane %v4510_v26, 7 }
 0x33c   :  { %v1158_v20 = vadd.f32 %v1150_v49, %v4501_v15  ;;  %v1160_v24 = vadd.f32 %v1152_v34, %v4507_v33 }
 0x33d   :  { %v3449_v38 = vmul.f32 -1.442695, %v1157_v17  ;;  %v3451_v23 = vmul.f32 -1.442695, %v1159_v18 }
 0x33e   :  { %v3450_v53 = vmul.f32 -1.442695, %v1158_v20  ;;  %v3452_v25 = vmul.f32 -1.442695, %v1160_v24 }
 0x33f   :  { %3933 = vpow2.f32 %v3449_v38 }
 0x340   :  { %3935 = vpow2.f32 %v3451_v23 }
 0x341   :  { %3937 = vpow2.f32 %v3450_v53 }
 0x342   :  { %3939 = vpow2.f32 %v3452_v25 }
 0x349   :  { %v3934_v21 = vpop.eup %3933 }
 0x34a   :  { %v3936_v27 = vpop.eup %3935  ;;  %v1173_v30 = vadd.f32 1.0, %v3934_v21 }
 0x34b   :  { %v3938_v28 = vpop.eup %3937  ;;  %v1175_v29 = vadd.f32 1.0, %v3936_v27 }
 0x34c   :  { %v1174_v31 = vadd.f32 1.0, %v3938_v28  ;;  %v3940_v32 = vpop.eup %3939 }
 0x34d   :  { %3941 = vrcp.f32 %v1175_v29  ;;  %v1176_v17 = vadd.f32 1.0, %v3940_v32 }
 0x34e   :  { %3943 = vrcp.f32 %v1174_v31 }
 0x34f   :  { %3945 = vrcp.f32 %v1173_v30 }
 0x350   :  { %3947 = vrcp.f32 %v1176_v17  ;;  %v4613_v17 = vld [vmem:[#allocation9 + $0x20] ss:$16 sps:$4 sm:$0xff]  }
 0x357   :  { %v3942_v35 = vpop.eup %3941 }
 0x358   :  { %v3944_v40 = vpop.eup %3943  ;;  %v1185_v47 = vmul.f32 2.0, %v3942_v35 }
 0x359   :  { %v1190_v49 = vmul.f32 %v3944_v40, %v1188_v36  ;;  %v3946_v16 = vpop.eup %3945  ;;  %v4597_v36 = vld [vmem:[#allocation9 + $0x4] ss:$16 sps:$4 sm:$0xff]   ;;  %v4599_v40 = vld [vmem:[#allocation9 + $0xc] ss:$16 sps:$4 sm:$0xff]  }
 0x35a   :  { %v3453_v50 = vadd.f32 -1.0, %v1185_v47  ;;  %v3948_v43 = vpop.eup %3947  ;;  %v4601_v47 = vld [vmem:[#allocation9] ss:$16 sps:$4 sm:$0xff]  }
 0x35c   :  { %v1191_v18 = vmul.f32 %v3946_v16, %v3453_v50  ;;  %v4609_v50 = vld [vmem:[#allocation9 + $0x24] ss:$16 sps:$4 sm:$0xff]   ;;  %v4611_v16 = vld [vmem:[#allocation9 + $0x2c] ss:$16 sps:$4 sm:$0xff]  }
 0x35e   :  { %v4552_v19 = vadd.f32 %v1191_v18, %v1190_v49  ;;  %v4603_v49 = vld [vmem:[#allocation9 + $0x8] ss:$16 sps:$4 sm:$0xff]  }
 0x35f   :  { %v4615_v18 = vld [vmem:[#allocation9 + $0x28] ss:$16 sps:$4 sm:$0xff]  }
 0x360   :  { %3949 = vtanh.f32 %v4552_v19 }
 0x36a   :  { %v3950_v20 = vpop.eup %3949 }
 0x36b   :  { %v1194_v38 = vmul.f32 %v3950_v20, %v3948_v43  ;;  %v4623_v43 = vld [vmem:[#allocation9 + $0x4c] ss:$16 sps:$4 sm:$0xff]   ;;  %v4625_v20 = vld [vmem:[#allocation9 + $0x40] ss:$16 sps:$4 sm:$0xff]  }
 0x36d   :  { %1195 = vst [vmem:[#allocation2] sm:$0x2] %v1194_v38  ;;  %v1196_v23 = vpack.c.bf16 %v1194_v38, %v1194_v38  ;;  %v4627_v38 = vld [vmem:[#allocation9 + $0x48] ss:$16 sps:$4 sm:$0xff]  }
 0x36f   :  { %v1230_v53 = vshrl.u32 %v1196_v23, 16  ;;  %v4633_v23 = vld [vmem:[#allocation9 + $0x60] ss:$16 sps:$4 sm:$0xff]  }
 0x371   :  { %1426 = vmatmul.mubr.bf16.vlgmr.msra.gmra.mrb[12].mxu0 %v1230_v53  ;;  %1467 = vmatmul.mubr.bf16.vlgmr.msra.gmra.mrb[20].mxu1 %v1230_v53  ;;  %v4635_v53 = vld [vmem:[#allocation9 + $0x64] ss:$16 sps:$4 sm:$0xff]  }
 0x372   :  { %1723 = vmatpush1.bf16.msra.mxu0 %v4343_v37  ;;  %1764 = vmatpush1.bf16.msra.mxu1 %v4379_v57 }
 0x373   :  { %1724 = vmatprep.subr.bf16.mxu0 %v4348_v41  ;;  %1765 = vmatprep.subr.bf16.mxu1 %v4381_v58 }
 0x374   :  { %1754 = vmatprep.mubr.bf16.mxu0 %v4213_v44  ;;  %1795 = vmatprep.mubr.bf16.mxu1 %v4213_v44 }
 0x376   :  { %1725 = vmatpush1.bf16.msra.mxu0 %v4351_v42  ;;  %1766 = vmatpush1.bf16.msra.mxu1 %v4386_v59 }
 0x377   :  { %1726 = vmatprep.subr.bf16.mxu0 %v4354_v45  ;;  %1767 = vmatprep.subr.bf16.mxu1 %v4389_v60 }
 0x37a   :  { %1727 = vmatpush1.bf16.msra.mxu0 %v4362_v48  ;;  %1768 = vmatpush1.bf16.msra.mxu1 %v4395_v61 }
 0x37b   :  { %1728 = vmatprep.subr.bf16.mxu0 %v4365_v51  ;;  %1769 = vmatprep.subr.bf16.mxu1 %v4397_v62 }
 0x37e   :  { %1729 = vmatpush1.bf16.msra.mxu0 %v4371_v54  ;;  %1770 = vmatpush1.bf16.msra.mxu1 %v4401_v63 }
 0x37f   :  { %1730 = vmatprep.subr.bf16.mxu0 %v4373_v55  ;;  %1771 = vmatprep.subr.bf16.mxu1 %v4403_v0 }
 0x382   :  { %1731 = vmatpush1.bf16.msra.mxu0 %v4377_v56  ;;  %1772 = vmatpush1.bf16.msra.mxu1 %v4408_v1 }
 0x383   :  { %1732 = vmatprep.subr.bf16.mxu0 %v4412_v2  ;;  %1773 = vmatprep.subr.bf16.mxu1 %v4414_v3 }
 0x386   :  { %1733 = vmatpush1.bf16.msra.mxu0 %v4416_v4  ;;  %1774 = vmatpush1.bf16.msra.mxu1 %v4418_v5 }
 0x387   :  { %1734 = vmatprep.subr.bf16.mxu0 %v4424_v6  ;;  %1775 = vmatprep.subr.bf16.mxu1 %v4426_v7 }
 0x38a   :  { %1735 = vmatpush1.bf16.msra.mxu0 %v4428_v8  ;;  %1776 = vmatpush1.bf16.msra.mxu1 %v4430_v9 }
 0x38b   :  { %1736 = vmatprep.subr.bf16.mxu0 %v4436_v10  ;;  %1777 = vmatprep.subr.bf16.mxu1 %v4438_v11 }
 0x38e   :  { %1737 = vmatpush1.bf16.msra.mxu0 %v4440_v12  ;;  %1778 = vmatpush1.bf16.msra.mxu1 %v4442_v13  ;;  %v1518_v12 = vrot.slane %v4552_v19, 7  ;;  %v4621_v19 = vld [vmem:[#allocation9 + $0x44] ss:$16 sps:$4 sm:$0xff]  }
 0x38f   :  { %2053 = vmatprep.subr.bf16.mxu0 %v4597_v36  ;;  %2094 = vmatprep.subr.bf16.mxu1 %v4599_v40 }
 0x444   :  { %v1427_v37 = vpop.f32.mrb[12].mxu0  ;;  %v1468_v41 = vpop.f32.mrb[20].mxu1 }
 0x445   :  { %v1479_v42 = vrot.slane %v1427_v37, 6  ;;  %v1481_v45 = vrot.slane %v1468_v41, 6  ;;  %v1429_v48 = vpop.f32.mrb[13].mxu0  ;;  %v1470_v51 = vpop.f32.mrb[21].mxu1  ;;  %v4637_v37 = vld [vmem:[#allocation9 + $0x68] ss:$16 sps:$4 sm:$0xff]  }
 0x446   :  { %v1480_v54 = vrot.slane %v1429_v48, 6  ;;  %v1431_v55 = vpop.f32.mrb[14].mxu0  ;;  %v1472_v56 = vpop.f32.mrb[22].mxu1  ;;  %v1482_v1 = vrot.slane %v1470_v51, 6  ;;  %v4639_v41 = vld [vmem:[#allocation9 + $0x6c] ss:$16 sps:$4 sm:$0xff]  }
 0x447   :  { %v1487_v57 = vadd.f32 %v1479_v42, %v4497_v52  ;;  %v1489_v58 = vadd.f32 %v1481_v45, %v4499_v14  ;;  %v1432_v59 = vpop.f32.mrb[15].mxu0  ;;  %v1473_v60 = vpop.f32.mrb[23].mxu1  ;;  %v4641_v42 = vld [vmem:[#allocation9 + $0x84] ss:$16 sps:$4 sm:$0xff]   ;;  %v4644_v45 = vld [vmem:[#allocation9 + $0x8c] ss:$16 sps:$4 sm:$0xff]  }
 0x448   :  { %v1488_v61 = vadd.f32 %v1480_v54, %v4501_v15  ;;  %v1490_v2 = vadd.f32 %v1482_v1, %v4507_v33  ;;  %v4648_v48 = vld [vmem:[#allocation9 + $0x80] ss:$16 sps:$4 sm:$0xff]   ;;  %v4652_v51 = vld [vmem:[#allocation9 + $0x88] ss:$16 sps:$4 sm:$0xff]   ;;  %v4654_v54 = vld [vmem:[#allocation9 + $0xa4] ss:$16 sps:$4 sm:$0xff]  }
 0x449   :  { %v3486_v62 = vmul.f32 -1.442695, %v1487_v57  ;;  %v3488_v63 = vmul.f32 -1.442695, %v1489_v58  ;;  %v4657_v55 = vld [vmem:[#allocation9 + $0xac] ss:$16 sps:$4 sm:$0xff]  }
 0x44a   :  { %v3487_v0 = vmul.f32 -1.442695, %v1488_v61  ;;  %v3489_v3 = vmul.f32 -1.442695, %v1490_v2  ;;  %v4660_v56 = vld [vmem:[#allocation9 + $0xa0] ss:$16 sps:$4 sm:$0xff]  }
 0x44b   :  { %3951 = vpow2.f32 %v3486_v62  ;;  %v4664_v57 = vld [vmem:[#allocation9 + $0xa8] ss:$16 sps:$4 sm:$0xff]   ;;  %v4666_v58 = vld [vmem:[#allocation9 + $0xc4] ss:$16 sps:$4 sm:$0xff]   ;;  %v4669_v59 = vld [vmem:[#allocation9 + $0xcc] ss:$16 sps:$4 sm:$0xff]  }
 0x44c   :  { %3953 = vpow2.f32 %v3488_v63  ;;  %v4672_v60 = vld [vmem:[#allocation9 + $0xc0] ss:$16 sps:$4 sm:$0xff]   ;;  %v4676_v61 = vld [vmem:[#allocation9 + $0xc8] ss:$16 sps:$4 sm:$0xff]   ;;  %v4678_v62 = vld [vmem:[#allocation9 + $0xe4] ss:$16 sps:$4 sm:$0xff]  }
 0x44d   :  { %3955 = vpow2.f32 %v3487_v0  ;;  %v4681_v63 = vld [vmem:[#allocation9 + $0xec] ss:$16 sps:$4 sm:$0xff]   ;;  %v4684_v0 = vld [vmem:[#allocation9 + $0xe0] ss:$16 sps:$4 sm:$0xff]   ;;  %v4688_v1 = vld [vmem:[#allocation9 + $0xe8] ss:$16 sps:$4 sm:$0xff]  }
 0x44e   :  { %3957 = vpow2.f32 %v3489_v3 }
 0x455   :  { %v3952_v4 = vpop.eup %3951 }
 0x456   :  { %v3954_v5 = vpop.eup %3953  ;;  %v1503_v9 = vadd.f32 1.0, %v3952_v4 }
 0x457   :  { %v3956_v6 = vpop.eup %3955  ;;  %v1505_v7 = vadd.f32 1.0, %v3954_v5 }
 0x458   :  { %v1504_v8 = vadd.f32 1.0, %v3956_v6  ;;  %v3958_v10 = vpop.eup %3957 }
 0x459   :  { %3959 = vrcp.f32 %v1505_v7  ;;  %v1506_v21 = vadd.f32 1.0, %v3958_v10 }
 0x45a   :  { %3961 = vrcp.f32 %v1504_v8 }
 0x45b   :  { %3963 = vrcp.f32 %v1503_v9 }
 0x45c   :  { %3965 = vrcp.f32 %v1506_v21 }
 0x463   :  { %v3960_v11 = vpop.eup %3959 }
 0x464   :  { %v3962_v13 = vpop.eup %3961  ;;  %v1515_v26 = vmul.f32 2.0, %v3960_v11 }
 0x465   :  { %v1520_v34 = vmul.f32 %v3962_v13, %v1518_v12  ;;  %v3964_v25 = vpop.eup %3963 }
 0x466   :  { %v3490_v24 = vadd.f32 -1.0, %v1515_v26  ;;  %v3966_v29 = vpop.eup %3965 }
 0x468   :  { %v1521_v27 = vmul.f32 %v3964_v25, %v3490_v24 }
 0x46a   :  { %v4592_v28 = vadd.f32 %v1521_v27, %v1520_v34 }
 0x46c   :  { %3967 = vtanh.f32 %v4592_v28 }
 0x476   :  { %v3968_v31 = vpop.eup %3967 }
 0x477   :  { %v1524_v30 = vmul.f32 %v3968_v31, %v3966_v29 }
 0x479   :  { %1525 = vst [vmem:[#allocation2] sm:$0x4] %v1524_v30  ;;  %v1526_v32 = vpack.c.bf16 %v1524_v30, %v1524_v30 }
 0x47b   :  { %v1560_v35 = vrot.slane %v1526_v32, 1 }
 0x47d   :  { %1755 = vmatmul.mubr.bf16.vlgmr.msra.gmra.mrb[16].mxu0 %v1560_v35  ;;  %1796 = vmatmul.mubr.bf16.vlgmr.msra.gmra.mrb[24].mxu1 %v1560_v35 }
 0x47e   :  { %2085 = vmatprep.mubr.bf16.mxu0 %v4213_v44  ;;  %2126 = vmatprep.mubr.bf16.mxu1 %v4213_v44 }
 0x47f   :  { %2054 = vmatpush1.bf16.msra.mxu0 %v4601_v47  ;;  %2095 = vmatpush1.bf16.msra.mxu1 %v4603_v49 }
 0x480   :  { %2055 = vmatprep.subr.bf16.mxu0 %v4609_v50  ;;  %2096 = vmatprep.subr.bf16.mxu1 %v4611_v16 }
 0x483   :  { %2056 = vmatpush1.bf16.msra.mxu0 %v4613_v17  ;;  %2097 = vmatpush1.bf16.msra.mxu1 %v4615_v18 }
 0x484   :  { %2057 = vmatprep.subr.bf16.mxu0 %v4621_v19  ;;  %2098 = vmatprep.subr.bf16.mxu1 %v4623_v43 }
 0x487   :  { %2058 = vmatpush1.bf16.msra.mxu0 %v4625_v20  ;;  %2099 = vmatpush1.bf16.msra.mxu1 %v4627_v38 }
 0x488   :  { %2059 = vmatprep.subr.bf16.mxu0 %v4635_v53  ;;  %2100 = vmatprep.subr.bf16.mxu1 %v4639_v41 }
 0x48b   :  { %2060 = vmatpush1.bf16.msra.mxu0 %v4633_v23  ;;  %2101 = vmatpush1.bf16.msra.mxu1 %v4637_v37 }
 0x48c   :  { %2061 = vmatprep.subr.bf16.mxu0 %v4641_v42  ;;  %2102 = vmatprep.subr.bf16.mxu1 %v4644_v45 }
 0x48f   :  { %2062 = vmatpush1.bf16.msra.mxu0 %v4648_v48  ;;  %2103 = vmatpush1.bf16.msra.mxu1 %v4652_v51 }
 0x490   :  { %2063 = vmatprep.subr.bf16.mxu0 %v4654_v54  ;;  %2104 = vmatprep.subr.bf16.mxu1 %v4657_v55 }
 0x493   :  { %2064 = vmatpush1.bf16.msra.mxu0 %v4660_v56  ;;  %2105 = vmatpush1.bf16.msra.mxu1 %v4664_v57 }
 0x494   :  { %2065 = vmatprep.subr.bf16.mxu0 %v4666_v58  ;;  %2106 = vmatprep.subr.bf16.mxu1 %v4669_v59 }
 0x497   :  { %2066 = vmatpush1.bf16.msra.mxu0 %v4672_v60  ;;  %2107 = vmatpush1.bf16.msra.mxu1 %v4676_v61 }
 0x498   :  { %2067 = vmatprep.subr.bf16.mxu0 %v4678_v62  ;;  %2108 = vmatprep.subr.bf16.mxu1 %v4681_v63 }
 0x49b   :  { %2068 = vmatpush1.bf16.msra.mxu0 %v4684_v0  ;;  %2109 = vmatpush1.bf16.msra.mxu1 %v4688_v1 }
 0x49c   :  { %2382 = vmatprep.subr.bf16.mxu0 %v4597_v36  ;;  %2423 = vmatprep.subr.bf16.mxu1 %v4599_v40 }
 0x550   :  { %v1756_v2 = vpop.f32.mrb[16].mxu0  ;;  %v1797_v3 = vpop.f32.mrb[24].mxu1 }
 0x551   :  { %v1808_v4 = vrot.slane %v1756_v2, 5  ;;  %v1810_v5 = vrot.slane %v1797_v3, 5  ;;  %v1758_v6 = vpop.f32.mrb[17].mxu0  ;;  %v1799_v7 = vpop.f32.mrb[25].mxu1 }
 0x552   :  { %v1809_v8 = vrot.slane %v1758_v6, 5  ;;  %v1760_v9 = vpop.f32.mrb[18].mxu0  ;;  %v1801_v10 = vpop.f32.mrb[26].mxu1  ;;  %v1811_v27 = vrot.slane %v1799_v7, 5 }
 0x553   :  { %v1816_v11 = vadd.f32 %v1808_v4, %v4497_v52  ;;  %v1818_v12 = vadd.f32 %v1810_v5, %v4499_v14  ;;  %v1761_v13 = vpop.f32.mrb[19].mxu0  ;;  %v1802_v26 = vpop.f32.mrb[27].mxu1 }
 0x554   :  { %v1817_v34 = vadd.f32 %v1809_v8, %v4501_v15  ;;  %v1819_v29 = vadd.f32 %v1811_v27, %v4507_v33  ;;  %v1847_v8 = vrot.slane %v4592_v28, 7 }
 0x555   :  { %v3523_v24 = vmul.f32 -1.442695, %v1816_v11  ;;  %v3525_v25 = vmul.f32 -1.442695, %v1818_v12 }
 0x556   :  { %v3524_v21 = vmul.f32 -1.442695, %v1817_v34  ;;  %v3526_v31 = vmul.f32 -1.442695, %v1819_v29 }
 0x557   :  { %3969 = vpow2.f32 %v3523_v24 }
 0x558   :  { %3971 = vpow2.f32 %v3525_v25 }
 0x559   :  { %3973 = vpow2.f32 %v3524_v21 }
 0x55a   :  { %3975 = vpow2.f32 %v3526_v31 }
 0x561   :  { %v3970_v30 = vpop.eup %3969 }
 0x562   :  { %v3972_v32 = vpop.eup %3971  ;;  %v1832_v4 = vadd.f32 1.0, %v3970_v30 }
 0x563   :  { %v3974_v35 = vpop.eup %3973  ;;  %v1834_v2 = vadd.f32 1.0, %v3972_v32 }
 0x564   :  { %v1833_v3 = vadd.f32 1.0, %v3974_v35  ;;  %v3976_v5 = vpop.eup %3975 }
 0x565   :  { %3977 = vrcp.f32 %v1834_v2  ;;  %v1835_v13 = vadd.f32 1.0, %v3976_v5 }
 0x566   :  { %3979 = vrcp.f32 %v1833_v3 }
 0x567   :  { %3981 = vrcp.f32 %v1832_v4 }
 0x568   :  { %3983 = vrcp.f32 %v1835_v13 }
 0x56f   :  { %v3978_v6 = vpop.eup %3977 }
 0x570   :  { %v3980_v9 = vpop.eup %3979  ;;  %v1844_v7 = vmul.f32 2.0, %v3978_v6 }
 0x571   :  { %v1849_v10 = vmul.f32 %v3980_v9, %v1847_v8  ;;  %v3982_v12 = vpop.eup %3981 }
 0x572   :  { %v3527_v11 = vadd.f32 -1.0, %v1844_v7  ;;  %v3984_v24 = vpop.eup %3983 }
 0x574   :  { %v1850_v26 = vmul.f32 %v3982_v12, %v3527_v11 }
 0x576   :  { %v4700_v34 = vadd.f32 %v1850_v26, %v1849_v10 }
 0x578   :  { %3985 = vtanh.f32 %v4700_v34 }
 0x582   :  { %v3986_v25 = vpop.eup %3985 }
 0x583   :  { %v1853_v21 = vmul.f32 %v3986_v25, %v3984_v24 }
 0x585   :  { %1854 = vst [vmem:[#allocation2] sm:$0x8] %v1853_v21  ;;  %v1855_v27 = vpack.c.bf16 %v1853_v21, %v1853_v21 }
 0x587   :  { %v1889_v29 = vshrl.u32 %v1855_v27, 16 }
 0x589   :  { %v1891_v31 = vrot.slane %v1889_v29, 1 }
 0x58b   :  { %2086 = vmatmul.mubr.bf16.vlgmr.msra.gmra.mrb[20].mxu0 %v1891_v31  ;;  %2127 = vmatmul.mubr.bf16.vlgmr.msra.gmra.mrb[28].mxu1 %v1891_v31 }
 0x58c   :  { %2383 = vmatpush1.bf16.msra.mxu0 %v4601_v47  ;;  %2424 = vmatpush1.bf16.msra.mxu1 %v4603_v49 }
 0x58d   :  { %2384 = vmatprep.subr.bf16.mxu0 %v4609_v50  ;;  %2425 = vmatprep.subr.bf16.mxu1 %v4611_v16 }
 0x58e   :  { %2414 = vmatprep.mubr.bf16.mxu0 %v4213_v44  ;;  %2455 = vmatprep.mubr.bf16.mxu1 %v4213_v44 }
 0x590   :  { %2385 = vmatpush1.bf16.msra.mxu0 %v4613_v17  ;;  %2426 = vmatpush1.bf16.msra.mxu1 %v4615_v18 }
 0x591   :  { %2386 = vmatprep.subr.bf16.mxu0 %v4621_v19  ;;  %2427 = vmatprep.subr.bf16.mxu1 %v4623_v43 }
 0x594   :  { %2387 = vmatpush1.bf16.msra.mxu0 %v4625_v20  ;;  %2428 = vmatpush1.bf16.msra.mxu1 %v4627_v38 }
 0x595   :  { %2388 = vmatprep.subr.bf16.mxu0 %v4635_v53  ;;  %2429 = vmatprep.subr.bf16.mxu1 %v4639_v41 }
 0x598   :  { %2389 = vmatpush1.bf16.msra.mxu0 %v4633_v23  ;;  %2430 = vmatpush1.bf16.msra.mxu1 %v4637_v37 }
 0x599   :  { %2390 = vmatprep.subr.bf16.mxu0 %v4641_v42  ;;  %2431 = vmatprep.subr.bf16.mxu1 %v4644_v45 }
 0x59c   :  { %2391 = vmatpush1.bf16.msra.mxu0 %v4648_v48  ;;  %2432 = vmatpush1.bf16.msra.mxu1 %v4652_v51 }
 0x59d   :  { %2392 = vmatprep.subr.bf16.mxu0 %v4654_v54  ;;  %2433 = vmatprep.subr.bf16.mxu1 %v4657_v55 }
 0x5a0   :  { %2393 = vmatpush1.bf16.msra.mxu0 %v4660_v56  ;;  %2434 = vmatpush1.bf16.msra.mxu1 %v4664_v57 }
 0x5a1   :  { %2394 = vmatprep.subr.bf16.mxu0 %v4666_v58  ;;  %2435 = vmatprep.subr.bf16.mxu1 %v4669_v59 }
 0x5a4   :  { %2395 = vmatpush1.bf16.msra.mxu0 %v4672_v60  ;;  %2436 = vmatpush1.bf16.msra.mxu1 %v4676_v61 }
 0x5a5   :  { %2396 = vmatprep.subr.bf16.mxu0 %v4678_v62  ;;  %2437 = vmatprep.subr.bf16.mxu1 %v4681_v63 }
 0x5a8   :  { %2397 = vmatpush1.bf16.msra.mxu0 %v4684_v0  ;;  %2438 = vmatpush1.bf16.msra.mxu1 %v4688_v1 }
 0x5a9   :  { %2713 = vmatprep.subr.bf16.mxu0 %v4597_v36  ;;  %2754 = vmatprep.subr.bf16.mxu1 %v4599_v40 }
 0x65e   :  { %v2087_v28 = vpop.f32.mrb[20].mxu0  ;;  %v2128_v30 = vpop.f32.mrb[28].mxu1 }
 0x65f   :  { %v2139_v32 = vrot.slane %v2087_v28, 4  ;;  %v2141_v35 = vrot.slane %v2128_v30, 4  ;;  %v2089_v2 = vpop.f32.mrb[21].mxu0  ;;  %v2130_v3 = vpop.f32.mrb[29].mxu1 }
 0x660   :  { %v2140_v4 = vrot.slane %v2089_v2, 4  ;;  %v2091_v5 = vpop.f32.mrb[22].mxu0  ;;  %v2132_v6 = vpop.f32.mrb[30].mxu1  ;;  %v2142_v24 = vrot.slane %v2130_v3, 4 }
 0x661   :  { %v2147_v8 = vadd.f32 %v2139_v32, %v4497_v52  ;;  %v2149_v9 = vadd.f32 %v2141_v35, %v4499_v14  ;;  %v2092_v7 = vpop.f32.mrb[23].mxu0  ;;  %v2133_v10 = vpop.f32.mrb[31].mxu1 }
 0x662   :  { %v2148_v11 = vadd.f32 %v2140_v4, %v4501_v15  ;;  %v2150_v25 = vadd.f32 %v2142_v24, %v4507_v33  ;;  %v2178_v4 = vrot.slane %v4700_v34, 7 }
 0x663   :  { %v3560_v12 = vmul.f32 -1.442695, %v2147_v8  ;;  %v3562_v13 = vmul.f32 -1.442695, %v2149_v9 }
 0x664   :  { %v3561_v26 = vmul.f32 -1.442695, %v2148_v11  ;;  %v3563_v21 = vmul.f32 -1.442695, %v2150_v25 }
 0x665   :  { %3987 = vpow2.f32 %v3560_v12 }
 0x666   :  { %3989 = vpow2.f32 %v3562_v13 }
 0x667   :  { %3991 = vpow2.f32 %v3561_v26 }
 0x668   :  { %3993 = vpow2.f32 %v3563_v21 }
 0x66f   :  { %v3988_v27 = vpop.eup %3987 }
 0x670   :  { %v3990_v29 = vpop.eup %3989  ;;  %v2163_v32 = vadd.f32 1.0, %v3988_v27 }
 0x671   :  { %v3992_v31 = vpop.eup %3991  ;;  %v2165_v28 = vadd.f32 1.0, %v3990_v29 }
 0x672   :  { %v2164_v30 = vadd.f32 1.0, %v3992_v31  ;;  %v3994_v35 = vpop.eup %3993 }
 0x673   :  { %3995 = vrcp.f32 %v2165_v28  ;;  %v2166_v7 = vadd.f32 1.0, %v3994_v35 }
 0x674   :  { %3997 = vrcp.f32 %v2164_v30 }
 0x675   :  { %3999 = vrcp.f32 %v2163_v32 }
 0x676   :  { %4001 = vrcp.f32 %v2166_v7 }
 0x67d   :  { %v3996_v2 = vpop.eup %3995 }
 0x67e   :  { %v3998_v5 = vpop.eup %3997  ;;  %v2175_v3 = vmul.f32 2.0, %v3996_v2 }
 0x67f   :  { %v2180_v6 = vmul.f32 %v3998_v5, %v2178_v4  ;;  %v4000_v9 = vpop.eup %3999 }
 0x680   :  { %v3564_v8 = vadd.f32 -1.0, %v2175_v3  ;;  %v4002_v12 = vpop.eup %4001 }
 0x682   :  { %v2181_v10 = vmul.f32 %v4000_v9, %v3564_v8 }
 0x684   :  { %v4742_v11 = vadd.f32 %v2181_v10, %v2180_v6 }
 0x686   :  { %4003 = vtanh.f32 %v4742_v11 }
 0x690   :  { %v4004_v13 = vpop.eup %4003 }
 0x691   :  { %v2184_v26 = vmul.f32 %v4004_v13, %v4002_v12 }
 0x693   :  { %2185 = vst [vmem:[#allocation2] sm:$0x10] %v2184_v26  ;;  %v2186_v24 = vpack.c.bf16 %v2184_v26, %v2184_v26 }
 0x695   :  { %v2220_v25 = vrot.slane %v2186_v24, 2 }
 0x697   :  { %2415 = vmatmul.mubr.bf16.vlgmr.msra.gmra.mrb[24].mxu0 %v2220_v25  ;;  %2456 = vmatmul.mubr.bf16.vlgmr.msra.gmra.mrb[32].mxu1 %v2220_v25 }
 0x698   :  { %2714 = vmatpush1.bf16.msra.mxu0 %v4601_v47  ;;  %2755 = vmatpush1.bf16.msra.mxu1 %v4603_v49 }
 0x699   :  { %2715 = vmatprep.subr.bf16.mxu0 %v4609_v50  ;;  %2756 = vmatprep.subr.bf16.mxu1 %v4611_v16 }
 0x69a   :  { %2745 = vmatprep.mubr.bf16.mxu0 %v4213_v44  ;;  %2786 = vmatprep.mubr.bf16.mxu1 %v4213_v44 }
 0x69c   :  { %2716 = vmatpush1.bf16.msra.mxu0 %v4613_v17  ;;  %2757 = vmatpush1.bf16.msra.mxu1 %v4615_v18 }
 0x69d   :  { %2717 = vmatprep.subr.bf16.mxu0 %v4621_v19  ;;  %2758 = vmatprep.subr.bf16.mxu1 %v4623_v43 }
 0x6a0   :  { %2718 = vmatpush1.bf16.msra.mxu0 %v4625_v20  ;;  %2759 = vmatpush1.bf16.msra.mxu1 %v4627_v38 }
 0x6a1   :  { %2719 = vmatprep.subr.bf16.mxu0 %v4635_v53  ;;  %2760 = vmatprep.subr.bf16.mxu1 %v4639_v41 }
 0x6a4   :  { %2720 = vmatpush1.bf16.msra.mxu0 %v4633_v23  ;;  %2761 = vmatpush1.bf16.msra.mxu1 %v4637_v37 }
 0x6a5   :  { %2721 = vmatprep.subr.bf16.mxu0 %v4641_v42  ;;  %2762 = vmatprep.subr.bf16.mxu1 %v4644_v45 }
 0x6a8   :  { %2722 = vmatpush1.bf16.msra.mxu0 %v4648_v48  ;;  %2763 = vmatpush1.bf16.msra.mxu1 %v4652_v51 }
 0x6a9   :  { %2723 = vmatprep.subr.bf16.mxu0 %v4654_v54  ;;  %2764 = vmatprep.subr.bf16.mxu1 %v4657_v55 }
 0x6ac   :  { %2724 = vmatpush1.bf16.msra.mxu0 %v4660_v56  ;;  %2765 = vmatpush1.bf16.msra.mxu1 %v4664_v57 }
 0x6ad   :  { %2725 = vmatprep.subr.bf16.mxu0 %v4666_v58  ;;  %2766 = vmatprep.subr.bf16.mxu1 %v4669_v59 }
 0x6b0   :  { %2726 = vmatpush1.bf16.msra.mxu0 %v4672_v60  ;;  %2767 = vmatpush1.bf16.msra.mxu1 %v4676_v61 }
 0x6b1   :  { %2727 = vmatprep.subr.bf16.mxu0 %v4678_v62  ;;  %2768 = vmatprep.subr.bf16.mxu1 %v4681_v63 }
 0x6b4   :  { %2728 = vmatpush1.bf16.msra.mxu0 %v4684_v0  ;;  %2769 = vmatpush1.bf16.msra.mxu1 %v4688_v1 }
 0x6b5   :  { %3042 = vmatprep.subr.bf16.mxu0 %v4597_v36  ;;  %3083 = vmatprep.subr.bf16.mxu1 %v4599_v40 }
 0x76a   :  { %v2416_v34 = vpop.f32.mrb[24].mxu0  ;;  %v2457_v21 = vpop.f32.mrb[32].mxu1 }
 0x76b   :  { %v2468_v27 = vrot.slane %v2416_v34, 3  ;;  %v2470_v29 = vrot.slane %v2457_v21, 3  ;;  %v2418_v31 = vpop.f32.mrb[25].mxu0  ;;  %v2459_v28 = vpop.f32.mrb[33].mxu1 }
 0x76c   :  { %v2469_v30 = vrot.slane %v2418_v31, 3  ;;  %v2420_v32 = vpop.f32.mrb[26].mxu0  ;;  %v2461_v35 = vpop.f32.mrb[34].mxu1  ;;  %v2471_v9 = vrot.slane %v2459_v28, 3 }
 0x76d   :  { %v2476_v2 = vadd.f32 %v2468_v27, %v4497_v52  ;;  %v2478_v4 = vadd.f32 %v2470_v29, %v4499_v14  ;;  %v2421_v5 = vpop.f32.mrb[27].mxu0  ;;  %v2462_v3 = vpop.f32.mrb[35].mxu1  ;;  %v2507_v29 = vrot.slane %v4742_v11, 7 }
 0x76e   :  { %v2477_v6 = vadd.f32 %v2469_v30, %v4501_v15  ;;  %v2479_v7 = vadd.f32 %v2471_v9, %v4507_v33 }
 0x76f   :  { %v3597_v36 = vmul.f32 -1.442695, %v2476_v2  ;;  %v3599_v8 = vmul.f32 -1.442695, %v2478_v4 }
 0x770   :  { %v3598_v40 = vmul.f32 -1.442695, %v2477_v6  ;;  %v3600_v10 = vmul.f32 -1.442695, %v2479_v7 }
 0x771   :  { %4005 = vpow2.f32 %v3597_v36 }
 0x772   :  { %4007 = vpow2.f32 %v3599_v8 }
 0x773   :  { %4009 = vpow2.f32 %v3598_v40 }
 0x774   :  { %4011 = vpow2.f32 %v3600_v10 }
 0x77b   :  { %v4006_v12 = vpop.eup %4005 }
 0x77c   :  { %v4008_v13 = vpop.eup %4007  ;;  %v2492_v34 = vadd.f32 1.0, %v4006_v12 }
 0x77d   :  { %v4010_v26 = vpop.eup %4009  ;;  %v2494_v24 = vadd.f32 1.0, %v4008_v13 }
 0x77e   :  { %v2493_v25 = vadd.f32 1.0, %v4010_v26  ;;  %v4012_v21 = vpop.eup %4011 }
 0x77f   :  { %4013 = vrcp.f32 %v2494_v24  ;;  %v2495_v2 = vadd.f32 1.0, %v4012_v21 }
 0x780   :  { %4015 = vrcp.f32 %v2493_v25 }
 0x781   :  { %4017 = vrcp.f32 %v2492_v34 }
 0x782   :  { %4019 = vrcp.f32 %v2495_v2  ;;  %v3897_v2 = vld [vmem:[#allocation11 + $0x20] ss:$8 sps:$4 sm:$0xff]  }
 0x789   :  { %v4014_v27 = vpop.eup %4013 }
 0x78a   :  { %v4016_v31 = vpop.eup %4015  ;;  %v2504_v28 = vmul.f32 2.0, %v4014_v27 }
 0x78b   :  { %v2509_v30 = vmul.f32 %v4016_v31, %v2507_v29  ;;  %v4018_v35 = vpop.eup %4017  ;;  %v3893_v31 = vld [vmem:[#allocation11 + $0x4] ss:$8 sps:$4 sm:$0xff]  }
 0x78c   :  { %v3601_v32 = vadd.f32 -1.0, %v2504_v28  ;;  %v4020_v3 = vpop.eup %4019  ;;  %v3891_v28 = vld [vmem:[#allocation11] ss:$8 sps:$4 sm:$0xff]  }
 0x78e   :  { %v2510_v4 = vmul.f32 %v4018_v35, %v3601_v32  ;;  %v3894_v32 = vld [vmem:[#allocation11 + $0x10] ss:$8 sps:$4 sm:$0xff]   ;;  %v3899_v35 = vld [vmem:[#allocation11 + $0x24] ss:$8 sps:$4 sm:$0xff]  }
 0x790   :  { %v4784_v5 = vadd.f32 %v2510_v4, %v2509_v30  ;;  %v3896_v30 = vld [vmem:[#allocation11 + $0x14] ss:$8 sps:$4 sm:$0xff]  }
 0x791   :  { %v3902_v4 = vld [vmem:[#allocation11 + $0x34] ss:$8 sps:$4 sm:$0xff]  }
 0x792   :  { %4021 = vtanh.f32 %v4784_v5 }
 0x79c   :  { %v4022_v6 = vpop.eup %4021 }
 0x79d   :  { %v2513_v36 = vmul.f32 %v4022_v6, %v4020_v3  ;;  %v3905_v3 = vld [vmem:[#allocation11 + $0x44] ss:$8 sps:$4 sm:$0xff]   ;;  %v3903_v6 = vld [vmem:[#allocation11 + $0x40] ss:$8 sps:$4 sm:$0xff]  }
 0x79f   :  { %2514 = vst [vmem:[#allocation2] sm:$0x20] %v2513_v36  ;;  %v2515_v8 = vpack.c.bf16 %v2513_v36, %v2513_v36  ;;  %v3906_v36 = vld [vmem:[#allocation11 + $0x50] ss:$8 sps:$4 sm:$0xff]  }
 0x7a1   :  { %v2549_v40 = vshrl.u32 %v2515_v8, 16  ;;  %v3909_v8 = vld [vmem:[#allocation11 + $0x60] ss:$8 sps:$4 sm:$0xff]  }
 0x7a3   :  { %v2551_v9 = vrot.slane %v2549_v40, 2  ;;  %v3911_v40 = vld [vmem:[#allocation11 + $0x64] ss:$8 sps:$4 sm:$0xff]  }
 0x7a5   :  { %2746 = vmatmul.mubr.bf16.vlgmr.msra.gmra.mrb[28].mxu0 %v2551_v9  ;;  %2787 = vmatmul.mubr.bf16.vlgmr.msra.gmra.mrb[36].mxu1 %v2551_v9  ;;  %v3914_v9 = vld [vmem:[#allocation11 + $0x74] ss:$8 sps:$4 sm:$0xff]  }
 0x7a6   :  { %3043 = vmatpush1.bf16.msra.mxu0 %v4601_v47  ;;  %3084 = vmatpush1.bf16.msra.mxu1 %v4603_v49 }
 0x7a7   :  { %3044 = vmatprep.subr.bf16.mxu0 %v4609_v50  ;;  %3085 = vmatprep.subr.bf16.mxu1 %v4611_v16 }
 0x7a8   :  { %3074 = vmatprep.mubr.bf16.mxu0 %v4213_v44  ;;  %3115 = vmatprep.mubr.bf16.mxu1 %v4213_v44 }
 0x7aa   :  { %3045 = vmatpush1.bf16.msra.mxu0 %v4613_v17  ;;  %3086 = vmatpush1.bf16.msra.mxu1 %v4615_v18 }
 0x7ab   :  { %3046 = vmatprep.subr.bf16.mxu0 %v4621_v19  ;;  %3087 = vmatprep.subr.bf16.mxu1 %v4623_v43 }
 0x7ae   :  { %3047 = vmatpush1.bf16.msra.mxu0 %v4625_v20  ;;  %3088 = vmatpush1.bf16.msra.mxu1 %v4627_v38 }
 0x7af   :  { %3048 = vmatprep.subr.bf16.mxu0 %v4635_v53  ;;  %3089 = vmatprep.subr.bf16.mxu1 %v4639_v41 }
 0x7b2   :  { %3049 = vmatpush1.bf16.msra.mxu0 %v4633_v23  ;;  %3090 = vmatpush1.bf16.msra.mxu1 %v4637_v37 }
 0x7b3   :  { %3050 = vmatprep.subr.bf16.mxu0 %v4641_v42  ;;  %3091 = vmatprep.subr.bf16.mxu1 %v4644_v45 }
 0x7b6   :  { %3051 = vmatpush1.bf16.msra.mxu0 %v4648_v48  ;;  %3092 = vmatpush1.bf16.msra.mxu1 %v4652_v51 }
 0x7b7   :  { %3052 = vmatprep.subr.bf16.mxu0 %v4654_v54  ;;  %3093 = vmatprep.subr.bf16.mxu1 %v4657_v55 }
 0x7ba   :  { %3053 = vmatpush1.bf16.msra.mxu0 %v4660_v56  ;;  %3094 = vmatpush1.bf16.msra.mxu1 %v4664_v57 }
 0x7bb   :  { %3054 = vmatprep.subr.bf16.mxu0 %v4666_v58  ;;  %3095 = vmatprep.subr.bf16.mxu1 %v4669_v59 }
 0x7be   :  { %3055 = vmatpush1.bf16.msra.mxu0 %v4672_v60  ;;  %3096 = vmatpush1.bf16.msra.mxu1 %v4676_v61 }
 0x7bf   :  { %3056 = vmatprep.subr.bf16.mxu0 %v4678_v62  ;;  %3097 = vmatprep.subr.bf16.mxu1 %v4681_v63 }
 0x7c2   :  { %3057 = vmatpush1.bf16.msra.mxu0 %v4684_v0  ;;  %3098 = vmatpush1.bf16.msra.mxu1 %v4688_v1  ;;  %v2838_v0 = vrot.slane %v4784_v5, 7  ;;  %v3900_v5 = vld [vmem:[#allocation11 + $0x30] ss:$8 sps:$4 sm:$0xff]  }
 0x7c3   :  { %3285 = vmatprep.subr.bf16.mxu0 %v3893_v31 }
 0x878   :  { %v2747_v47 = vpop.f32.mrb[28].mxu0  ;;  %v2788_v49 = vpop.f32.mrb[36].mxu1 }
 0x879   :  { %v2799_v50 = vrot.slane %v2747_v47, 2  ;;  %v2801_v16 = vrot.slane %v2788_v49, 2  ;;  %v2749_v17 = vpop.f32.mrb[29].mxu0  ;;  %v2790_v18 = vpop.f32.mrb[37].mxu1  ;;  %v3912_v47 = vld [vmem:[#allocation11 + $0x70] ss:$8 sps:$4 sm:$0xff]  }
 0x87a   :  { %v2800_v19 = vrot.slane %v2749_v17, 2  ;;  %v2751_v43 = vpop.f32.mrb[30].mxu0  ;;  %v2792_v20 = vpop.f32.mrb[38].mxu1  ;;  %v2802_v51 = vrot.slane %v2790_v18, 2 }
 0x87b   :  { %v2807_v38 = vadd.f32 %v2799_v50, %v4497_v52  ;;  %v2809_v23 = vadd.f32 %v2801_v16, %v4499_v14  ;;  %v2752_v53 = vpop.f32.mrb[31].mxu0  ;;  %v2793_v37 = vpop.f32.mrb[39].mxu1 }
 0x87c   :  { %v2808_v41 = vadd.f32 %v2800_v19, %v4501_v15  ;;  %v2810_v54 = vadd.f32 %v2802_v51, %v4507_v33 }
 0x87d   :  { %v3634_v42 = vmul.f32 -1.442695, %v2807_v38  ;;  %v3636_v45 = vmul.f32 -1.442695, %v2809_v23 }
 0x87e   :  { %v3635_v48 = vmul.f32 -1.442695, %v2808_v41  ;;  %v3637_v55 = vmul.f32 -1.442695, %v2810_v54 }
 0x87f   :  { %4023 = vpow2.f32 %v3634_v42 }
 0x880   :  { %4025 = vpow2.f32 %v3636_v45 }
 0x881   :  { %4027 = vpow2.f32 %v3635_v48 }
 0x882   :  { %4029 = vpow2.f32 %v3637_v55 }
 0x889   :  { %v4024_v56 = vpop.eup %4023 }
 0x88a   :  { %v4026_v57 = vpop.eup %4025  ;;  %v2823_v61 = vadd.f32 1.0, %v4024_v56 }
 0x88b   :  { %v4028_v58 = vpop.eup %4027  ;;  %v2825_v59 = vadd.f32 1.0, %v4026_v57 }
 0x88c   :  { %v2824_v60 = vadd.f32 1.0, %v4028_v58  ;;  %v4030_v62 = vpop.eup %4029 }
 0x88d   :  { %4031 = vrcp.f32 %v2825_v59  ;;  %v2826_v13 = vadd.f32 1.0, %v4030_v62 }
 0x88e   :  { %4033 = vrcp.f32 %v2824_v60 }
 0x88f   :  { %4035 = vrcp.f32 %v2823_v61 }
 0x890   :  { %4037 = vrcp.f32 %v2826_v13 }
 0x897   :  { %v4032_v63 = vpop.eup %4031 }
 0x898   :  { %v4034_v1 = vpop.eup %4033  ;;  %v2835_v11 = vmul.f32 2.0, %v4032_v63 }
 0x899   :  { %v2840_v7 = vmul.f32 %v4034_v1, %v2838_v0  ;;  %v4036_v12 = vpop.eup %4035 }
 0x89a   :  { %v3638_v10 = vadd.f32 -1.0, %v2835_v11  ;;  %v4038_v25 = vpop.eup %4037 }
 0x89c   :  { %v2841_v26 = vmul.f32 %v4036_v12, %v3638_v10 }
 0x89e   :  { %v4824_v24 = vadd.f32 %v2841_v26, %v2840_v7 }
 0x8a0   :  { %4039 = vtanh.f32 %v4824_v24  ;;  %v3167_v62 = vrot.slane %v4824_v24, 7  ;;  %v3193_v24 = vld [vmem:[%s4860_s8] sm:$0x3] }
 0x8aa   :  { %v4040_v34 = vpop.eup %4039 }
 0x8ab   :  { %v2844_v21 = vmul.f32 %v4040_v34, %v4038_v25 }
 0x8ad   :  { %2845 = vst [vmem:[#allocation2] sm:$0x40] %v2844_v21  ;;  %v2846_v27 = vpack.c.bf16 %v2844_v21, %v2844_v21 }
 0x8af   :  { %v2880_v29 = vrot.slane %v2846_v27, 3  ;;  %v3198_v27 = vrot.slane %v3193_v24, %v415_v39 }
 0x8b1   :  { %3075 = vmatmul.mubr.bf16.vlgmr.msra.gmra.mrb[32].mxu0 %v2880_v29  ;;  %3116 = vmatmul.mubr.bf16.vlgmr.msra.gmra.mrb[40].mxu1 %v2880_v29  ;;  %v3202_v29 = vrot.slane %v3193_v24, %v419_v46 }
 0x8b2   :  { %3317 = vmatprep.mubr.bf16.mxu0 %v4213_v44  ;;  %3286 = vmatpush1.bf16.msra.mxu0 %v3891_v28  ;;  %v3908_v44 = vld [vmem:[#allocation11 + $0x54] ss:$8 sps:$4 sm:$0xff]  }
 0x8b3   :  { %3287 = vmatprep.subr.bf16.mxu0 %v3896_v30 }
 0x8b6   :  { %3288 = vmatpush1.bf16.msra.mxu0 %v3894_v32 }
 0x8b7   :  { %3289 = vmatprep.subr.bf16.mxu0 %v3899_v35 }
 0x8ba   :  { %3290 = vmatpush1.bf16.msra.mxu0 %v3897_v2 }
 0x8bb   :  { %3291 = vmatprep.subr.bf16.mxu0 %v3902_v4 }
 0x8be   :  { %3292 = vmatpush1.bf16.msra.mxu0 %v3900_v5 }
 0x8bf   :  { %3293 = vmatprep.subr.bf16.mxu0 %v3905_v3 }
 0x8c2   :  { %3294 = vmatpush1.bf16.msra.mxu0 %v3903_v6 }
 0x8c3   :  { %3295 = vmatprep.subr.bf16.mxu0 %v3908_v44 }
 0x8c6   :  { %3296 = vmatpush1.bf16.msra.mxu0 %v3906_v36 }
 0x8c7   :  { %3297 = vmatprep.subr.bf16.mxu0 %v3911_v40 }
 0x8ca   :  { %3298 = vmatpush1.bf16.msra.mxu0 %v3909_v8 }
 0x8cb   :  { %3299 = vmatprep.subr.bf16.mxu0 %v3914_v9 }
 0x8ce   :  { %3300 = vmatpush1.bf16.msra.mxu0 %v3912_v47 }
 0x984   :  { %v3076_v49 = vpop.f32.mrb[32].mxu0  ;;  %v3117_v50 = vpop.f32.mrb[40].mxu1 }
 0x985   :  { %v3128_v16 = vrot.slane %v3076_v49, 1  ;;  %v3130_v17 = vrot.slane %v3117_v50, 1  ;;  %v3078_v18 = vpop.f32.mrb[33].mxu0  ;;  %v3119_v19 = vpop.f32.mrb[41].mxu1 }
 0x986   :  { %v3129_v43 = vrot.slane %v3078_v18, 1  ;;  %v3080_v20 = vpop.f32.mrb[34].mxu0  ;;  %v3121_v38 = vpop.f32.mrb[42].mxu1  ;;  %v3131_v54 = vrot.slane %v3119_v19, 1 }
 0x987   :  { %v3136_v23 = vadd.f32 %v3128_v16, %v4497_v52  ;;  %v3138_v53 = vadd.f32 %v3130_v17, %v4499_v14  ;;  %v3081_v37 = vpop.f32.mrb[35].mxu0  ;;  %v3122_v41 = vpop.f32.mrb[43].mxu1 }
 0x988   :  { %v3137_v42 = vadd.f32 %v3129_v43, %v4501_v15  ;;  %v3139_v55 = vadd.f32 %v3131_v54, %v4507_v33 }
 0x989   :  { %v3671_v45 = vmul.f32 -1.442695, %v3136_v23  ;;  %v3673_v48 = vmul.f32 -1.442695, %v3138_v53 }
 0x98a   :  { %v3672_v51 = vmul.f32 -1.442695, %v3137_v42  ;;  %v3674_v56 = vmul.f32 -1.442695, %v3139_v55 }
 0x98b   :  { %4041 = vpow2.f32 %v3671_v45 }
 0x98c   :  { %4043 = vpow2.f32 %v3673_v48 }
 0x98d   :  { %4045 = vpow2.f32 %v3672_v51 }
 0x98e   :  { %4047 = vpow2.f32 %v3674_v56 }
 0x995   :  { %v4042_v57 = vpop.eup %4041 }
 0x996   :  { %v4044_v58 = vpop.eup %4043  ;;  %v3152_v14 = vadd.f32 1.0, %v4042_v57 }
 0x997   :  { %v4046_v59 = vpop.eup %4045  ;;  %v3154_v52 = vadd.f32 1.0, %v4044_v58 }
 0x998   :  { %v3153_v60 = vadd.f32 1.0, %v4046_v59  ;;  %v4048_v15 = vpop.eup %4047 }
 0x999   :  { %4049 = vrcp.f32 %v3154_v52  ;;  %v3155_v7 = vadd.f32 1.0, %v4048_v15 }
 0x99a   :  { %4051 = vrcp.f32 %v3153_v60 }
 0x99b   :  { %4053 = vrcp.f32 %v3152_v14 }
 0x99c   :  { %4055 = vrcp.f32 %v3155_v7 }
 0x9a3   :  { %v4050_v61 = vpop.eup %4049 }
 0x9a4   :  { %v4052_v63 = vpop.eup %4051  ;;  %v3164_v0 = vmul.f32 2.0, %v4050_v61 }
 0x9a5   :  { %v3169_v1 = vmul.f32 %v4052_v63, %v3167_v62  ;;  %v4054_v33 = vpop.eup %4053 }
 0x9a6   :  { %v3675_v11 = vadd.f32 -1.0, %v3164_v0  ;;  %v4056_v13 = vpop.eup %4055 }
 0x9a8   :  { %v3170_v10 = vmul.f32 %v4054_v33, %v3675_v11 }
 0x9aa   :  { %v3171_v12 = vadd.f32 %v3170_v10, %v3169_v1 }
 0x9ac   :  { %4057 = vtanh.f32 %v3171_v12 }
 0x9b6   :  { %v4058_v26 = vpop.eup %4057 }
 0x9b7   :  { %v3173_v25 = vmul.f32 %v4058_v26, %v4056_v13 }
 0x9b9   :  { %3174 = vst [vmem:[#allocation2] sm:$0x80] %v3173_v25 }
 0x9c0   :  { %v3175_v34 = vld [vmem:[#allocation2] sm:$0xff] }
 0x9c1   :  { %v3176_v21 = vpack.c.bf16 %v3175_v34, %v3175_v34 }
 0x9c3   :  { %3318 = vmatmul.mubr.bf16.vlgmr.msra.gmra.mrb[36].mxu0 %v3176_v21 }
 0xa96   :  { %v3319_v31 = vpop.f32.mrb[36].mxu0 }
 0xa97   :  { %v3320_v28 = vadd.f32 %v3319_v31, %v3198_v27  ;;  %v3321_v30 = vpop.f32.mrb[37].mxu0 }
 0xa98   :  { %v3322_v32 = vadd.f32 %v3321_v30, %v3202_v29  ;;  %v3323_v35 = vpop.f32.mrb[38].mxu0 }
 0xa99   :  { %3326 = vst [vmem:[#allocation12] sm:$0xff] %v3320_v28  ;;  %v3324_v2 = vpop.f32.mrb[39].mxu0 }
 0xa9a   :  { %3327 = vst [vmem:[#allocation12 + $0x8] sm:$0xff] %v3322_v32 }
 0xa9b   :  { %4180 = shalt.err (!%p4177_p2)
}
 0xa9c   :  { %s4181_s17 = scalar_lea.hbm %s4861_s9, 256 }
 0xa9d   :  { %p4182_p3 = scmp.ne.s32.totalorder %s4861_s9, %s4181_s17  ;;  %p4185_p4 = scmp.lt.u32.totalorder %s4181_s17, %s4861_s9 }
 0xa9f   :  { %p4187_p5 = pnand %p4185_p4, %p4182_p3 }
 0xaa1   :  { %4190 = shalt.err (!%p4187_p5)
}
 0xaa2   :  { %3337 = dma.vmem_to_hbm [thread:$0]  %s3335_s1, 256, %s4861_s9, [#allocation5]  }
 0xaa3   :  { %4197 = dma.done.wait [#allocation5], 256  }
 0xaa4   :  { %4198 = vsyncadd [#allocation5], 4294967040 }
 0xaa5   :  { %3341 = vsyncpa [#allocation4], 1 }
 0xaa6   :  { %3342 = vsyncpa [#allocation7], 1 }
 0xaa7   :  { %3343 = vsyncpa [#allocation10], 1 }
 0xaa8   :  { %3344 = vsyncpa [#allocation5], 1 }

</bundles_post_ra>
